<compile_context>
chip_gen: v6e
topology: v6e:2x2x1
jax: 0.10.0
libtpu: 0.0.40
codegen_flags: <defaults>
</compile_context>

<pallas_src>
import functools

import numpy as np

import jax
import jax.numpy as jnp
from jax import lax
from jax.experimental import pallas as pl
from jax.experimental.pallas import tpu as pltpu


def _round_up(n, m):
    return (n + m - 1) // m * m


# ----------------------------------------------------------------------------
# Pallas kernel 1: lane-dense conv matmul with optional multi-group accumulation
#   out[b] = act( sum_g W_g @ relu_in(P_g[b]) + bias )
# ----------------------------------------------------------------------------
def _conv_matmul_kernel(*refs, n_groups, in_relu, out_relu):
    """refs = (w_0, p_0, ..., w_{G-1}, p_{G-1}, bias, out)

    w_g  : (Cout, Kg)        resident weight slab (bf16/f32)
    p_g  : (1, Kg, Npix)     im2col patches of the current batch element
    bias : (Cout, 1)         f32
    out  : (1, Cout, Npix)   f32 -- lane-dense store (Npix = Ho*Wo)
    """
    out_ref = refs[-1]
    bias_ref = refs[-2]
    acc = None
    for g in range(n_groups):
        w = refs[2 * g][...]
        p = refs[2 * g + 1][0]
        if in_relu:                      # ReLU on the input feature map, fused
            p = jnp.maximum(p, 0).astype(p.dtype)
        part = jnp.dot(w, p, preferred_element_type=jnp.float32)
        acc = part if acc is None else acc + part
    acc = acc + bias_ref[...]            # (Cout, Npix) + (Cout, 1)
    if out_relu:
        acc = jnp.maximum(acc, 0.0)
    out_ref[0] = acc.astype(out_ref.dtype)


def _im2col(x, k, stride, padding):
    """x:(B,C,H,W) -> patches:(B, C*k*k, Ho*Wo) with (ci, kh, kw) flattening order
    (matches w.reshape(Cout, C*k*k))."""
    B, C, H, W = x.shape
    xp = jnp.pad(x, ((0, 0), (0, 0), (padding, padding), (padding, padding)))
    Ho = (H + 2 * padding - k) // stride + 1
    Wo = (W + 2 * padding - k) // stride + 1
    cols = []
    for ih in range(k):
        for iw in range(k):
            cols.append(xp[:, :, ih:ih + stride * Ho:stride, iw:iw + stride * Wo:stride])
    patches = jnp.stack(cols, axis=2)                      # (B, C, k*k, Ho, Wo)
    return patches.reshape(B, C * k * k, Ho * Wo), Ho, Wo


def conv2d_fused(inputs, bias, *, stride=1, padding=0,
                 in_relu=False, out_relu=False, use_bf16=True):
    """Conv2d with PyTorch semantics, lowered to one lane-dense Pallas matmul.

    inputs : list of (x, w) pairs sharing Cout / kernel size / stride / padding
             and output spatial size.  Multiple pairs == a channel-concatenated
             input conv without materializing the concat.
      x : (B, Ci, H, W)      w : (Cout, Ci, k, k)
    bias : (Cout,)
    returns (B, Cout, Ho, Wo) float32.
    """
    dt = jnp.bfloat16 if use_bf16 else jnp.float32
    B = inputs[0][0].shape[0]
    Cout = inputs[0][1].shape[0]
    k = inputs[0][1].shape[2]

    groups = []
    Np = Ho = Wo = None
    for x, w in inputs:
        assert w.shape[0] == Cout and w.shape[2] == k and w.shape[3] == k
        patches, Ho, Wo = _im2col(x, k, stride, padding)
        K = patches.shape[1]
        Kp = _round_up(K, 128)                                   # clean MXU K passes
        patches = jnp.pad(patches, ((0, 0), (0, Kp - K), (0, 0))).astype(dt)
        wmat = jnp.pad(w.reshape(Cout, K), ((0, 0), (0, Kp - K))).astype(dt)
        if Np is None:
            Np = Ho * Wo
        assert Np == Ho * Wo
        groups.append((wmat, patches, Kp))

    bias2 = bias.reshape(Cout, 1).astype(jnp.float32)

    in_specs = []
    args = []
    for wmat, patches, Kp in groups:
        in_specs.append(pl.BlockSpec((Cout, Kp), lambda b: (0, 0)))       # resident W
        in_specs.append(pl.BlockSpec((1, Kp, Np), lambda b: (b, 0, 0)))   # per-batch patches
        args += [wmat, patches]
    in_specs.append(pl.BlockSpec((Cout, 1), lambda b: (0, 0)))            # resident bias
    args.append(bias2)

    kern = functools.partial(_conv_matmul_kernel, n_groups=len(groups),
                             in_relu=in_relu, out_relu=out_relu)

    out = pl.pallas_call(
        kern,
        out_shape=jax.ShapeDtypeStruct((B, Cout, Np), jnp.float32),
        grid_spec=pltpu.PrefetchScalarGridSpec(
            num_scalar_prefetch=0,
            grid=(B,),                                   # >= 2 parallel steps for v7x
            in_specs=in_specs,
            out_specs=pl.BlockSpec((1, Cout, Np), lambda b: (b, 0, 0)),
        ),
        compiler_params=pltpu.CompilerParams(dimension_semantics=("parallel",)),
    )(*args)
    # (B, Cout, Ho*Wo) is already NCHW order: a free reshape, no transpose.
    return out.reshape(B, Cout, Ho, Wo)


# ----------------------------------------------------------------------------
# Pallas kernel 2: fused separable bilinear resize (both passes in one kernel)
#   out[b, c] = Mh @ x[b, c] @ Mw^T        (F.interpolate, align_corners=False)
# ----------------------------------------------------------------------------
def _bilinear_kernel(mh_ref, mwt_ref, x_ref, o_ref, *, channels):
    """mh:(Ho,H), mwt:(W,Wo), x:(1,C,H,W), o:(1,C,Ho,Wo); all f32."""
    mh = mh_ref[...]
    mwt = mwt_ref[...]
    for c in range(channels):                         # static unroll, C in {3, 8}
        t = jnp.dot(mh, x_ref[0, c, :, :], preferred_element_type=jnp.float32)   # (Ho, W)
        o_ref[0, c, :, :] = jnp.dot(t, mwt, preferred_element_type=jnp.float32)  # (Ho, Wo)


def _bilinear_matrix_np(in_size, out_size):
    """PyTorch bilinear (align_corners=False, antialias=False) as a dense matrix."""
    i = np.arange(out_size, dtype=np.float64)
    src = (i + 0.5) * (in_size / out_size) - 0.5
    src = np.maximum(src, 0.0)                         # PyTorch clamps negative src to 0
    x0 = np.floor(src).astype(np.int64)
    w1 = src - x0
    w0 = 1.0 - w1
    x1 = np.minimum(x0 + 1, in_size - 1)
    m = np.zeros((out_size, in_size), np.float32)
    m[np.arange(out_size), x0] += w0.astype(np.float32)
    m[np.arange(out_size), x1] += w1.astype(np.float32)
    return m                                           # (out, in)


def bilinear_resize(x, out_h, out_w):
    """x:(B,C,H,W) f32 -> (B,C,out_h,out_w) f32, single fused Pallas kernel."""
    B, C, H, W = x.shape
    mh = jnp.asarray(_bilinear_matrix_np(H, out_h), jnp.float32)        # (out_h, H)
    mwt = jnp.asarray(_bilinear_matrix_np(W, out_w).T, jnp.float32)     # (W, out_w)
    kern = functools.partial(_bilinear_kernel, channels=C)
    return pl.pallas_call(
        kern,
        out_shape=jax.ShapeDtypeStruct((B, C, out_h, out_w), jnp.float32),
        grid_spec=pltpu.PrefetchScalarGridSpec(
            num_scalar_prefetch=0,
            grid=(B,),
            in_specs=[
                pl.BlockSpec((out_h, H), lambda b: (0, 0)),
                pl.BlockSpec((W, out_w), lambda b: (0, 0)),
                pl.BlockSpec((1, C, H, W), lambda b: (b, 0, 0, 0)),
            ],
            out_specs=pl.BlockSpec((1, C, out_h, out_w), lambda b: (b, 0, 0, 0)),
        ),
        compiler_params=pltpu.CompilerParams(dimension_semantics=("parallel",)),
    )(mh, mwt, x.astype(jnp.float32))


# ----------------------------------------------------------------------------
# MergedNetwork.forward
# ----------------------------------------------------------------------------
def merged_forward(params, x, *, skip_imagenet_branch=False, use_bf16=True):
    """x: (B, 3, 32, 32) NCHW -> (B, 10, 32, 32)."""
    c_img = params["imagenet_w"].shape[0]

    # lowerLayersOfSimpleModel: Conv2d(3,16,3,p=1) + ReLU
    simple_feat = conv2d_fused([(x, params["simple_w"])], params["simple_b"],
                               stride=1, padding=1, out_relu=True, use_bf16=use_bf16)

    w_new_img = params["new_w"][:, :c_img]
    w_new_simple = params["new_w"][:, c_img:]

    if skip_imagenet_branch:
        # new_w[:, :c_img] is identically zero (module init), so the whole ImageNet
        # branch (upsample -> 7x7/s8 conv -> downsample) contributes exactly 0.
        new_out = conv2d_fused([(simple_feat, w_new_simple)], params["new_b"],
                               stride=1, padding=1, use_bf16=use_bf16)
    else:
        # F.interpolate(x, (224,224)) ; lowerLayersOfImageNet ; F.interpolate(., (32,32))
        # TODO(synk): the upsample + 7x7/s8 conv could be folded into one precomputed
        # separable operator on the 32x32 input to avoid materializing the 224x224 image.
        x224 = bilinear_resize(x, 224, 224)
        img_feat = conv2d_fused([(x224, params["imagenet_w"])], params["imagenet_b"],
                                stride=8, padding=3, out_relu=True, use_bf16=use_bf16)
        img_feat = bilinear_resize(img_feat, simple_feat.shape[2], simple_feat.shape[3])
        # torch.cat([imageNet, simple], dim=1) + newConvolutionLayer, with the concat
        # eliminated: the two K-groups are accumulated inside one Pallas kernel.
        new_out = conv2d_fused([(img_feat, w_new_img), (simple_feat, w_new_simple)],
                               params["new_b"], stride=1, padding=1, use_bf16=use_bf16)

    # upperLayersOfSimpleModel = ReLU + Conv2d(24, 10, 1); the ReLU is fused (in_relu).
    return conv2d_fused([(new_out, params["upper_w"])], params["upper_b"],
                        stride=1, padding=0, in_relu=True, use_bf16=use_bf16)


# ----------------------------------------------------------------------------
# Pure-XLA f32 reference (test harness only, not the kernel path)
# ----------------------------------------------------------------------------
def reference_forward(params, x):
    def conv(x, w, b, stride=1, padding=0):
        out = lax.conv_general_dilated(
            x, w, window_strides=(stride, stride),
            padding=[(padding, padding), (padding, padding)],
            dimension_numbers=("NCHW", "OIHW", "NCHW"),
            precision=lax.Precision.HIGHEST)
        return out + b[None, :, None, None]

    def resize(x, oh, ow):
        mh = jnp.asarray(_bilinear_matrix_np(x.shape[2], oh))
        mw = jnp.asarray(_bilinear_matrix_np(x.shape[3], ow))
        return jnp.einsum("oh,bchw,vw->bcov", mh, x, mw)

    relu = jax.nn.relu
    xi = resize(x, 224, 224)
    img = relu(conv(xi, params["imagenet_w"], params["imagenet_b"], stride=8, padding=3))
    img = resize(img, 32, 32)
    simple = relu(conv(x, params["simple_w"], params["simple_b"], stride=1, padding=1))
    merged = jnp.concatenate([img, simple], axis=1)
    new = conv(merged, params["new_w"], params["new_b"], stride=1, padding=1)
    return conv(relu(new), params["upper_w"], params["upper_b"], stride=1, padding=0)


if __name__ == "__main__":
    key = jax.random.PRNGKey(0)
    ks = jax.random.split(key, 8)

    B = 2
    C_IMG, C_SIMPLE, C_MERGE_OUT, C_FINAL = 8, 16, 24, 10
    x = jax.random.normal(ks[0], (B, 3, 32, 32), jnp.float32)

    # Deterministic synthetic parameters (shapes implied by the module).
    imagenet_w = 0.05 * jax.random.normal(ks[1], (C_IMG, 3, 7, 7), jnp.float32)
    imagenet_b = 0.05 * jax.random.normal(ks[2], (C_IMG,), jnp.float32)
    simple_w = 0.10 * jax.random.normal(ks[3], (C_SIMPLE, 3, 3, 3), jnp.float32)
    simple_b = 0.10 * jax.random.normal(ks[4], (C_SIMPLE,), jnp.float32)
    replaced_w = 0.05 * jax.random.normal(ks[5], (C_MERGE_OUT, C_SIMPLE, 3, 3), jnp.float32)
    replaced_b = 0.05 * jax.random.normal(ks[6], (C_MERGE_OUT,), jnp.float32)

    # newConvolutionLayer init exactly as in __init__: zeros, then copy the replaced
    # simple-model layer into the non-ImageNet input channels.
    new_w = jnp.zeros((C_MERGE_OUT, C_IMG + C_SIMPLE, 3, 3), jnp.float32)
    new_w = new_w.at[:, C_IMG:, :, :].set(replaced_w)
    new_b = replaced_b

    upper_w = 0.10 * jax.random.normal(ks[7], (C_FINAL, C_MERGE_OUT, 1, 1), jnp.float32)
    upper_b = jnp.zeros((C_FINAL,), jnp.float32)

    params = dict(
        imagenet_w=imagenet_w, imagenet_b=imagenet_b,
        simple_w=simple_w, simple_b=simple_b,
        new_w=new_w, new_b=new_b,
        upper_w=upper_w, upper_b=upper_b,
    )

    # Static (host-side) check: the module zeroes new_w[:, :C_IMG], so the ImageNet
    # branch is provably dead compute -> skip it deliberately.
    skip_img = bool(np.all(np.asarray(new_w[:, :C_IMG]) == 0.0))

    fwd_fast = jax.jit(functools.partial(
        merged_forward, skip_imagenet_branch=skip_img, use_bf16=True))
    out = jax.block_until_ready(fwd_fast(params, x))
    assert out.shape == (B, C_FINAL, 32, 32), out.shape
    assert out.dtype == jnp.float32

    # Correctness checks: un-skipped Pallas path (exercises the resize + two-group
    # conv kernels) must match the skipped path exactly, and both must match a
    # pure-XLA f32 reference to within bf16 tolerance.
    fwd_full = jax.jit(functools.partial(
        merged_forward, skip_imagenet_branch=False, use_bf16=True))
    out_full = jax.block_until_ready(fwd_full(params, x))
    ref = jax.block_until_ready(jax.jit(reference_forward)(params, x))
    np.testing.assert_allclose(np.asarray(out), np.asarray(out_full), rtol=1e-4, atol=1e-4)
    np.testing.assert_allclose(np.asarray(out_full), np.asarray(ref), rtol=5e-2, atol=5e-2)

    print("KERNEL_OK")
</pallas_src>

<mosaic_0001>
module attributes {stable_mosaic.version = 11 : i64} {
  func.func @_conv_matmul_kernel(%arg0: i32, %arg1: memref<16x128xbf16, #tpu.memory_space<vmem>>, %arg2: memref<1x128x1024xbf16, #tpu.memory_space<vmem>>, %arg3: memref<16x1xf32, #tpu.memory_space<vmem>>, %arg4: memref<1x16x1024xf32, #tpu.memory_space<vmem>>) attributes {dimension_semantics = [#tpu.dimension_semantics<parallel>], iteration_bounds = array<i64: 2>, scalar_prefetch = 0 : i64, scratch_operands = 0 : i64, tpu.core_type = #tpu.core_type<tc>, window_params = [{pipeline_mode = #tpu.pipeline_mode<synchronous>, transform_indices = @transform_0, window_bounds = array<i64: 16, 128>}, {transform_indices = @transform_1, window_bounds = array<i64: 1, 128, 1024>}, {pipeline_mode = #tpu.pipeline_mode<synchronous>, transform_indices = @transform_2, window_bounds = array<i64: 16, 1>}, {transform_indices = @transform_3, window_bounds = array<i64: 1, 16, 1024>}]} {
    %c0 = arith.constant 0 : index
    %c0_0 = arith.constant 0 : index
    %0 = vector.load %arg1[%c0, %c0_0] : memref<16x128xbf16, #tpu.memory_space<vmem>>, vector<16x128xbf16>
    %c0_1 = arith.constant 0 : index
    %c0_2 = arith.constant 0 : index
    %c0_3 = arith.constant 0 : index
    %1 = vector.load %arg2[%c0_1, %c0_2, %c0_3] : memref<1x128x1024xbf16, #tpu.memory_space<vmem>>, vector<1x128x1024xbf16>
    %2 = vector.shape_cast %1 : vector<1x128x1024xbf16> to vector<128x1024xbf16>
    %cst = arith.constant dense<0.000000e+00> : vector<16x1024xf32>
    %3 = tpu.matmul %0, %2, %cst {dimension_numbers = #tpu.dot_dimension_numbers<[1], [0], [0], [1], [0, 0, 1, 1], [], []>} : vector<16x128xbf16>, vector<128x1024xbf16>, vector<16x1024xf32> -> vector<16x1024xf32>
    %c0_4 = arith.constant 0 : index
    %c0_5 = arith.constant 0 : index
    %4 = vector.load %arg3[%c0_4, %c0_5] : memref<16x1xf32, #tpu.memory_space<vmem>>, vector<16x1xf32>
    %5 = vector.broadcast %4 : vector<16x1xf32> to vector<16x1024xf32>
    %6 = arith.addf %3, %5 : vector<16x1024xf32>
    %cst_6 = arith.constant 0.000000e+00 : f32
    %7 = vector.broadcast %cst_6 : f32 to vector<16x1024xf32>
    %8 = arith.maximumf %6, %7 : vector<16x1024xf32>
    %c0_7 = arith.constant 0 : index
    %c0_8 = arith.constant 0 : index
    %c0_9 = arith.constant 0 : index
    %9 = vector.load %arg4[%c0_7, %c0_8, %c0_9] : memref<1x16x1024xf32, #tpu.memory_space<vmem>>, vector<1x16x1024xf32>
    %10 = vector.shape_cast %9 : vector<1x16x1024xf32> to vector<16x1024xf32>
    %11 = vector.shape_cast %8 : vector<16x1024xf32> to vector<1x16x1024xf32>
    tpu.vector_store %arg4[%c0_7, %c0_8, %c0_9], %11 {strides = array<i32>} : memref<1x16x1024xf32, #tpu.memory_space<vmem>>, vector<1x16x1024xf32>,
    return
  }
  func.func @transform_0(%arg0: i32) -> (i32, i32) {
    %c0_i32 = arith.constant 0 : i32
    %c0_i32_0 = arith.constant 0 : i32
    %c0_i32_1 = arith.constant 0 : i32
    return %c0_i32, %c0_i32_0 : i32, i32
  }
  func.func @transform_1(%arg0: i32) -> (i32, i32, i32) {
    %c0_i32 = arith.constant 0 : i32
    %c0_i32_0 = arith.constant 0 : i32
    %c0_i32_1 = arith.constant 0 : i32
    return %arg0, %c0_i32, %c0_i32_0 : i32, i32, i32
  }
  func.func @transform_2(%arg0: i32) -> (i32, i32) {
    %c0_i32 = arith.constant 0 : i32
    %c0_i32_0 = arith.constant 0 : i32
    %c0_i32_1 = arith.constant 0 : i32
    return %c0_i32, %c0_i32_0 : i32, i32
  }
  func.func @transform_3(%arg0: i32) -> (i32, i32, i32) {
    %c0_i32 = arith.constant 0 : i32
    %c0_i32_0 = arith.constant 0 : i32
    %c0_i32_1 = arith.constant 0 : i32
    return %arg0, %c0_i32, %c0_i32_0 : i32, i32, i32
  }
}

module attributes {stable_mosaic.version = 11 : i64} {
  func.func @_conv_matmul_kernel(%arg0: i32, %arg1: memref<24x256xbf16, #tpu.memory_space<vmem>>, %arg2: memref<1x256x1024xbf16, #tpu.memory_space<vmem>>, %arg3: memref<24x1xf32, #tpu.memory_space<vmem>>, %arg4: memref<1x24x1024xf32, #tpu.memory_space<vmem>>) attributes {dimension_semantics = [#tpu.dimension_semantics<parallel>], iteration_bounds = array<i64: 2>, scalar_prefetch = 0 : i64, scratch_operands = 0 : i64, tpu.core_type = #tpu.core_type<tc>, window_params = [{pipeline_mode = #tpu.pipeline_mode<synchronous>, transform_indices = @transform_0, window_bounds = array<i64: 24, 256>}, {transform_indices = @transform_1, window_bounds = array<i64: 1, 256, 1024>}, {pipeline_mode = #tpu.pipeline_mode<synchronous>, transform_indices = @transform_2, window_bounds = array<i64: 24, 1>}, {transform_indices = @transform_3, window_bounds = array<i64: 1, 24, 1024>}]} {
    %c0 = arith.constant 0 : index
    %c0_0 = arith.constant 0 : index
    %0 = vector.load %arg1[%c0, %c0_0] : memref<24x256xbf16, #tpu.memory_space<vmem>>, vector<24x256xbf16>
    %c0_1 = arith.constant 0 : index
    %c0_2 = arith.constant 0 : index
    %c0_3 = arith.constant 0 : index
    %1 = vector.load %arg2[%c0_1, %c0_2, %c0_3] : memref<1x256x1024xbf16, #tpu.memory_space<vmem>>, vector<1x256x1024xbf16>
    %2 = vector.shape_cast %1 : vector<1x256x1024xbf16> to vector<256x1024xbf16>
    %cst = arith.constant dense<0.000000e+00> : vector<24x1024xf32>
    %3 = tpu.matmul %0, %2, %cst {dimension_numbers = #tpu.dot_dimension_numbers<[1], [0], [0], [1], [0, 0, 1, 1], [], []>} : vector<24x256xbf16>, vector<256x1024xbf16>, vector<24x1024xf32> -> vector<24x1024xf32>
    %c0_4 = arith.constant 0 : index
    %c0_5 = arith.constant 0 : index
    %4 = vector.load %arg3[%c0_4, %c0_5] : memref<24x1xf32, #tpu.memory_space<vmem>>, vector<24x1xf32>
    %5 = vector.broadcast %4 : vector<24x1xf32> to vector<24x1024xf32>
    %6 = arith.addf %3, %5 : vector<24x1024xf32>
    %c0_6 = arith.constant 0 : index
    %c0_7 = arith.constant 0 : index
    %c0_8 = arith.constant 0 : index
    %7 = vector.load %arg4[%c0_6, %c0_7, %c0_8] : memref<1x24x1024xf32, #tpu.memory_space<vmem>>, vector<1x24x1024xf32>
    %8 = vector.shape_cast %7 : vector<1x24x1024xf32> to vector<24x1024xf32>
    %9 = vector.shape_cast %6 : vector<24x1024xf32> to vector<1x24x1024xf32>
    tpu.vector_store %arg4[%c0_6, %c0_7, %c0_8], %9 {strides = array<i32>} : memref<1x24x1024xf32, #tpu.memory_space<vmem>>, vector<1x24x1024xf32>,
    return
  }
  func.func @transform_0(%arg0: i32) -> (i32, i32) {
    %c0_i32 = arith.constant 0 : i32
    %c0_i32_0 = arith.constant 0 : i32
    %c0_i32_1 = arith.constant 0 : i32
    return %c0_i32, %c0_i32_0 : i32, i32
  }
  func.func @transform_1(%arg0: i32) -> (i32, i32, i32) {
    %c0_i32 = arith.constant 0 : i32
    %c0_i32_0 = arith.constant 0 : i32
    %c0_i32_1 = arith.constant 0 : i32
    return %arg0, %c0_i32, %c0_i32_0 : i32, i32, i32
  }
  func.func @transform_2(%arg0: i32) -> (i32, i32) {
    %c0_i32 = arith.constant 0 : i32
    %c0_i32_0 = arith.constant 0 : i32
    %c0_i32_1 = arith.constant 0 : i32
    return %c0_i32, %c0_i32_0 : i32, i32
  }
  func.func @transform_3(%arg0: i32) -> (i32, i32, i32) {
    %c0_i32 = arith.constant 0 : i32
    %c0_i32_0 = arith.constant 0 : i32
    %c0_i32_1 = arith.constant 0 : i32
    return %arg0, %c0_i32, %c0_i32_0 : i32, i32, i32
  }
}

module attributes {stable_mosaic.version = 11 : i64} {
  func.func @_conv_matmul_kernel(%arg0: i32, %arg1: memref<10x128xbf16, #tpu.memory_space<vmem>>, %arg2: memref<1x128x1024xbf16, #tpu.memory_space<vmem>>, %arg3: memref<10x1xf32, #tpu.memory_space<vmem>>, %arg4: memref<1x10x1024xf32, #tpu.memory_space<vmem>>) attributes {dimension_semantics = [#tpu.dimension_semantics<parallel>], iteration_bounds = array<i64: 2>, scalar_prefetch = 0 : i64, scratch_operands = 0 : i64, tpu.core_type = #tpu.core_type<tc>, window_params = [{pipeline_mode = #tpu.pipeline_mode<synchronous>, transform_indices = @transform_0, window_bounds = array<i64: 10, 128>}, {transform_indices = @transform_1, window_bounds = array<i64: 1, 128, 1024>}, {pipeline_mode = #tpu.pipeline_mode<synchronous>, transform_indices = @transform_2, window_bounds = array<i64: 10, 1>}, {transform_indices = @transform_3, window_bounds = array<i64: 1, 10, 1024>}]} {
    %c0 = arith.constant 0 : index
    %c0_0 = arith.constant 0 : index
    %0 = vector.load %arg1[%c0, %c0_0] : memref<10x128xbf16, #tpu.memory_space<vmem>>, vector<10x128xbf16>
    %c0_1 = arith.constant 0 : index
    %c0_2 = arith.constant 0 : index
    %c0_3 = arith.constant 0 : index
    %1 = vector.load %arg2[%c0_1, %c0_2, %c0_3] : memref<1x128x1024xbf16, #tpu.memory_space<vmem>>, vector<1x128x1024xbf16>
    %2 = vector.shape_cast %1 : vector<1x128x1024xbf16> to vector<128x1024xbf16>
    %cst = arith.constant 0.000000e+00 : bf16
    %3 = vector.broadcast %cst : bf16 to vector<128x1024xbf16>
    %4 = arith.maximumf %2, %3 : vector<128x1024xbf16>
    %cst_4 = arith.constant dense<0.000000e+00> : vector<10x1024xf32>
    %5 = tpu.matmul %0, %4, %cst_4 {dimension_numbers = #tpu.dot_dimension_numbers<[1], [0], [0], [1], [0, 0, 1, 1], [], []>} : vector<10x128xbf16>, vector<128x1024xbf16>, vector<10x1024xf32> -> vector<10x1024xf32>
    %c0_5 = arith.constant 0 : index
    %c0_6 = arith.constant 0 : index
    %6 = vector.load %arg3[%c0_5, %c0_6] : memref<10x1xf32, #tpu.memory_space<vmem>>, vector<10x1xf32>
    %7 = vector.broadcast %6 : vector<10x1xf32> to vector<10x1024xf32>
    %8 = arith.addf %5, %7 : vector<10x1024xf32>
    %c0_7 = arith.constant 0 : index
    %c0_8 = arith.constant 0 : index
    %c0_9 = arith.constant 0 : index
    %9 = vector.load %arg4[%c0_7, %c0_8, %c0_9] : memref<1x10x1024xf32, #tpu.memory_space<vmem>>, vector<1x10x1024xf32>
    %10 = vector.shape_cast %9 : vector<1x10x1024xf32> to vector<10x1024xf32>
    %11 = vector.shape_cast %8 : vector<10x1024xf32> to vector<1x10x1024xf32>
    tpu.vector_store %arg4[%c0_7, %c0_8, %c0_9], %11 {strides = array<i32>} : memref<1x10x1024xf32, #tpu.memory_space<vmem>>, vector<1x10x1024xf32>,
    return
  }
  func.func @transform_0(%arg0: i32) -> (i32, i32) {
    %c0_i32 = arith.constant 0 : i32
    %c0_i32_0 = arith.constant 0 : i32
    %c0_i32_1 = arith.constant 0 : i32
    return %c0_i32, %c0_i32_0 : i32, i32
  }
  func.func @transform_1(%arg0: i32) -> (i32, i32, i32) {
    %c0_i32 = arith.constant 0 : i32
    %c0_i32_0 = arith.constant 0 : i32
    %c0_i32_1 = arith.constant 0 : i32
    return %arg0, %c0_i32, %c0_i32_0 : i32, i32, i32
  }
  func.func @transform_2(%arg0: i32) -> (i32, i32) {
    %c0_i32 = arith.constant 0 : i32
    %c0_i32_0 = arith.constant 0 : i32
    %c0_i32_1 = arith.constant 0 : i32
    return %c0_i32, %c0_i32_0 : i32, i32
  }
  func.func @transform_3(%arg0: i32) -> (i32, i32, i32) {
    %c0_i32 = arith.constant 0 : i32
    %c0_i32_0 = arith.constant 0 : i32
    %c0_i32_1 = arith.constant 0 : i32
    return %arg0, %c0_i32, %c0_i32_0 : i32, i32, i32
  }
}

</mosaic_0001>

<bundles_post_ra>
// kernel: merged_forward.3
= control target key start
LH: loop header
LB: loop body
LE: loop exit
PB: predicated region body
PF: predicated region fallthrough
CT: control target
= control target key end

     0   :  { %s953_s12 = smov 0   ;;  %s1078_s0 = inlined_call_operand.vmem [shape: bf16[16,128], index: 0, kind: input, shape index: {}]   ;;  %s1079_s1 = inlined_call_operand.vmem [shape: bf16[2,128,1024], index: 1, kind: input, shape index: {}]   ;;  %s1080_s2 = inlined_call_operand.vmem [shape: f32[16,1], index: 2, kind: input, shape index: {}]   ;;  %s1081_s3 = inlined_call_operand.vmem [shape: f32[2,16,1024], index: 3, kind: output, shape index: {}]  }
   0x1 LB: > { %s835_s13 = sadd.s32 4294967295, %s930_s12   ;;  %p839_p0 = scmp.ge.s32.totalorder %s930_s12, 1  ;;  %s930_s12 = sphi %s953_s12, %s13_s12  }
   0x2   : > { %p137_p1 = scmp.lt.s32.totalorder %s930_s12, 3 }
   0x4   : > { %p138_p2 = pnand %p839_p0, %p137_p1 }
   0x5   : > { %p161_p3 = scmp.lt.s32.totalorder (!%p138_p2), %s835_s13, 1 }
   0x6   : > { %141 = sbr.rel (%p138_p2) target bundleno = 287 (0x11f), region = 32 }
   0xb   : > { %v932_v0 = vmov 0   ;;  %v238_v1 = vld [vmem:[%s1080_s2] sm:$0xff]  ;;  %s1083_s13 = smov (!%p161_p3, %s835_s13), 1  ;;  %v239_v2 = vld [vmem:[%s1080_s2 + $0x8] sm:$0xff] }
   0xc   : > { %608 = vmatprep.mubr.bf16.mxu0 %v932_v0  ;;  %651 = vmatprep.mubr.bf16.mxu1 %v932_v0  ;;  %s911_s16 = sshll.u32 %s1083_s13, 9  ;;  %s912_s24 = sshll.u32 %s1083_s13, 7 }
   0xd   : > { %922 = vset.pattern.permute.xlu0 %v932_v0  ;;  %s976_s21 = scalar_lea.vmem %s1079_s1, %s911_s16  ;;  %s1057_s27 = scalar_lea.vmem %s1081_s3, %s912_s24 }
   0xe   : > { %242 = vperm.xlu0 %922, %v238_v1   ;;  %v230_v3 = vld [vmem:[%s976_s21 + $0x1c0] sm:$0xff]  ;;  %v231_v5 = vld [vmem:[%s976_s21 + $0x1c8] sm:$0xff] }
   0xf   : > { %v234_v4 = vld [vmem:[%s976_s21 + $0x1e0] sm:$0xff]  ;;  %v235_v7 = vld [vmem:[%s976_s21 + $0x1e8] sm:$0xff] }
  0x10   : > { %v902_v6 = vcombine.high %v230_v3, %v234_v4  ;;  %v901_v8 = vcombine.low %v230_v3, %v234_v4  ;;  %v222_v9 = vld [vmem:[%s976_s21 + $0x180] sm:$0xff]  ;;  %v904_v11 = vcombine.high %v231_v5, %v235_v7  ;;  %v903_v12 = vcombine.low %v231_v5, %v235_v7  ;;  %v223_v14 = vld [vmem:[%s976_s21 + $0x188] sm:$0xff]  ;;  %v236_v3 = vld [vmem:[%s976_s21 + $0x1f0] sm:$0xff] }
  0x11   : > { %v226_v10 = vld [vmem:[%s976_s21 + $0x1a0] sm:$0xff]  ;;  %v227_v15 = vld [vmem:[%s976_s21 + $0x1a8] sm:$0xff]  ;;  %v233_v4 = vld [vmem:[%s976_s21 + $0x1d8] sm:$0xff] }
  0x12   : > { %247 = vperm.xlu0 %922, %v239_v2   ;;  %v894_v13 = vcombine.high %v222_v9, %v226_v10  ;;  %v214_v16 = vld [vmem:[%s976_s21 + $0x140] sm:$0xff]  ;;  %576 = vmatprep.subr.bf16.mxu0 %v902_v6  ;;  %v896_v17 = vcombine.high %v223_v14, %v227_v15  ;;  %v215_v19 = vld [vmem:[%s976_s21 + $0x148] sm:$0xff]  ;;  %v893_v21 = vcombine.low %v222_v9, %v226_v10  ;;  %v232_v2 = vld [vmem:[%s976_s21 + $0x1d0] sm:$0xff] }
  0x13   : > { %v218_v18 = vld [vmem:[%s976_s21 + $0x160] sm:$0xff]  ;;  %v219_v20 = vld [vmem:[%s976_s21 + $0x168] sm:$0xff]  ;;  %619 = vmatprep.subr.bf16.mxu1 %v904_v11  ;;  %577 = vmatpush1.bf16.msra.mxu0 %v901_v8  ;;  %v895_v22 = vcombine.low %v223_v14, %v227_v15  ;;  %v237_v5 = vld [vmem:[%s976_s21 + $0x1f8] sm:$0xff]  ;;  %v906_v8 = vcombine.high %v232_v2, %v236_v3  ;;  %v905_v15 = vcombine.low %v232_v2, %v236_v3 }
  0x14   : > { %620 = vmatpush1.bf16.msra.mxu1 %v903_v12  ;;  %578 = vmatprep.subr.bf16.mxu0 %v894_v13  ;;  %v886_v23 = vcombine.high %v214_v16, %v218_v18  ;;  %v888_v24 = vcombine.high %v215_v19, %v219_v20  ;;  %v206_v25 = vld [vmem:[%s976_s21 + $0x100] sm:$0xff]  ;;  %v207_v27 = vld [vmem:[%s976_s21 + $0x108] sm:$0xff]  ;;  %v885_v29 = vcombine.low %v214_v16, %v218_v18  ;;  %v224_v10 = vld [vmem:[%s976_s21 + $0x190] sm:$0xff] }
  0x15   : > { %621 = vmatprep.subr.bf16.mxu1 %v896_v17  ;;  %v210_v26 = vld [vmem:[%s976_s21 + $0x120] sm:$0xff]  ;;  %v211_v28 = vld [vmem:[%s976_s21 + $0x128] sm:$0xff]  ;;  %v887_v30 = vcombine.low %v215_v19, %v219_v20  ;;  %v908_v9 = vcombine.high %v233_v4, %v237_v5  ;;  %v228_v11 = vld [vmem:[%s976_s21 + $0x1b0] sm:$0xff]  ;;  %v907_v16 = vcombine.low %v233_v4, %v237_v5 }
  0x16   : > { %v878_v31 = vcombine.high %v206_v25, %v210_v26  ;;  %v880_v32 = vcombine.high %v207_v27, %v211_v28  ;;  %v198_v33 = vld [vmem:[%s976_s21 + $0xc0] sm:$0xff]  ;;  %v199_v35 = vld [vmem:[%s976_s21 + $0xc8] sm:$0xff]  ;;  %v877_v37 = vcombine.low %v206_v25, %v210_v26  ;;  %v879_v38 = vcombine.low %v207_v27, %v211_v28  ;;  %v225_v13 = vld [vmem:[%s976_s21 + $0x198] sm:$0xff] }
  0x17   : > { %579 = vmatpush1.bf16.msra.mxu0 %v893_v21  ;;  %v202_v34 = vld [vmem:[%s976_s21 + $0xe0] sm:$0xff]  ;;  %v203_v36 = vld [vmem:[%s976_s21 + $0xe8] sm:$0xff]  ;;  %v229_v14 = vld [vmem:[%s976_s21 + $0x1b8] sm:$0xff]  ;;  %v898_v17 = vcombine.high %v224_v10, %v228_v11 }
  0x18   : > { %622 = vmatpush1.bf16.msra.mxu1 %v895_v22  ;;  %580 = vmatprep.subr.bf16.mxu0 %v886_v23  ;;  %v870_v39 = vcombine.high %v198_v33, %v202_v34  ;;  %v872_v40 = vcombine.high %v199_v35, %v203_v36  ;;  %v190_v41 = vld [vmem:[%s976_s21 + $0x80] sm:$0xff]  ;;  %v191_v43 = vld [vmem:[%s976_s21 + $0x88] sm:$0xff]  ;;  %v869_v45 = vcombine.low %v198_v33, %v202_v34  ;;  %v216_v19 = vld [vmem:[%s976_s21 + $0x150] sm:$0xff] }
  0x19   : > { %623 = vmatprep.subr.bf16.mxu1 %v888_v24  ;;  %v194_v42 = vld [vmem:[%s976_s21 + $0xa0] sm:$0xff]  ;;  %v195_v44 = vld [vmem:[%s976_s21 + $0xa8] sm:$0xff]  ;;  %v871_v46 = vcombine.low %v199_v35, %v203_v36  ;;  %v900_v18 = vcombine.high %v225_v13, %v229_v14  ;;  %v220_v20 = vld [vmem:[%s976_s21 + $0x170] sm:$0xff]  ;;  %v897_v23 = vcombine.low %v224_v10, %v228_v11  ;;  %v899_v24 = vcombine.low %v225_v13, %v229_v14 }
  0x1a   : > { %v862_v47 = vcombine.high %v190_v41, %v194_v42  ;;  %v864_v48 = vcombine.high %v191_v43, %v195_v44  ;;  %v182_v49 = vld [vmem:[%s976_s21 + $0x40] sm:$0xff]  ;;  %v183_v51 = vld [vmem:[%s976_s21 + $0x48] sm:$0xff]  ;;  %v861_v53 = vcombine.low %v190_v41, %v194_v42  ;;  %v863_v54 = vcombine.low %v191_v43, %v195_v44  ;;  %v217_v21 = vld [vmem:[%s976_s21 + $0x158] sm:$0xff] }
  0x1b   : > { %581 = vmatpush1.bf16.msra.mxu0 %v885_v29  ;;  %v186_v50 = vld [vmem:[%s976_s21 + $0x60] sm:$0xff]  ;;  %v187_v52 = vld [vmem:[%s976_s21 + $0x68] sm:$0xff]  ;;  %v221_v22 = vld [vmem:[%s976_s21 + $0x178] sm:$0xff]  ;;  %v890_v25 = vcombine.high %v216_v19, %v220_v20 }
  0x1c   : > { %624 = vmatpush1.bf16.msra.mxu1 %v887_v30  ;;  %582 = vmatprep.subr.bf16.mxu0 %v878_v31  ;;  %v854_v55 = vcombine.high %v182_v49, %v186_v50  ;;  %v856_v56 = vcombine.high %v183_v51, %v187_v52  ;;  %v174_v57 = vld [vmem:[%s976_s21] sm:$0xff]  ;;  %v175_v59 = vld [vmem:[%s976_s21 + $0x8] sm:$0xff]  ;;  %v853_v61 = vcombine.low %v182_v49, %v186_v50  ;;  %v208_v27 = vld [vmem:[%s976_s21 + $0x110] sm:$0xff] }
  0x1d   : > { %625 = vmatprep.subr.bf16.mxu1 %v880_v32  ;;  %v178_v58 = vld [vmem:[%s976_s21 + $0x20] sm:$0xff]  ;;  %v179_v60 = vld [vmem:[%s976_s21 + $0x28] sm:$0xff]  ;;  %v855_v62 = vcombine.low %v183_v51, %v187_v52  ;;  %v892_v26 = vcombine.high %v217_v21, %v221_v22  ;;  %v212_v28 = vld [vmem:[%s976_s21 + $0x130] sm:$0xff]  ;;  %v889_v31 = vcombine.low %v216_v19, %v220_v20  ;;  %v891_v32 = vcombine.low %v217_v21, %v221_v22 }
  0x1e   : > { %v846_v63 = vcombine.high %v174_v57, %v178_v58  ;;  %v848_v1 = vcombine.high %v175_v59, %v179_v60  ;;  %v845_v6 = vcombine.low %v174_v57, %v178_v58  ;;  %v847_v7 = vcombine.low %v175_v59, %v179_v60  ;;  %v1019_v12 = vld [vmem:[%s1078_s0] sm:$0xff]   ;;  %v209_v29 = vld [vmem:[%s976_s21 + $0x118] sm:$0xff]  ;;  %v200_v35 = vld [vmem:[%s976_s21 + $0xd0] sm:$0xff] }
  0x1f   : > { %583 = vmatpush1.bf16.msra.mxu0 %v877_v37  ;;  %v213_v30 = vld [vmem:[%s976_s21 + $0x138] sm:$0xff]  ;;  %v882_v33 = vcombine.high %v208_v27, %v212_v28  ;;  %v204_v36 = vld [vmem:[%s976_s21 + $0xf0] sm:$0xff] }
  0x20   : > { %626 = vmatpush1.bf16.msra.mxu1 %v879_v38  ;;  %584 = vmatprep.subr.bf16.mxu0 %v870_v39  ;;  %v884_v34 = vcombine.high %v209_v29, %v213_v30  ;;  %v201_v37 = vld [vmem:[%s976_s21 + $0xd8] sm:$0xff]  ;;  %v881_v39 = vcombine.low %v208_v27, %v212_v28  ;;  %v192_v42 = vld [vmem:[%s976_s21 + $0x90] sm:$0xff] }
  0x21   : > { %627 = vmatprep.subr.bf16.mxu1 %v872_v40  ;;  %v205_v38 = vld [vmem:[%s976_s21 + $0xf8] sm:$0xff]  ;;  %v874_v40 = vcombine.high %v200_v35, %v204_v36  ;;  %v196_v43 = vld [vmem:[%s976_s21 + $0xb0] sm:$0xff] }
  0x22   : > { %v876_v41 = vcombine.high %v201_v37, %v205_v38  ;;  %v193_v44 = vld [vmem:[%s976_s21 + $0x98] sm:$0xff]  ;;  %v184_v50 = vld [vmem:[%s976_s21 + $0x50] sm:$0xff] }
  0x23   : > { %585 = vmatpush1.bf16.msra.mxu0 %v869_v45  ;;  %v197_v45 = vld [vmem:[%s976_s21 + $0xb8] sm:$0xff]  ;;  %v188_v51 = vld [vmem:[%s976_s21 + $0x70] sm:$0xff] }
  0x24   : > { %628 = vmatpush1.bf16.msra.mxu1 %v871_v46  ;;  %586 = vmatprep.subr.bf16.mxu0 %v862_v47  ;;  %v873_v46 = vcombine.low %v200_v35, %v204_v36  ;;  %v875_v47 = vcombine.low %v201_v37, %v205_v38  ;;  %v868_v49 = vcombine.high %v193_v44, %v197_v45  ;;  %v185_v52 = vld [vmem:[%s976_s21 + $0x58] sm:$0xff]  ;;  %v176_v58 = vld [vmem:[%s976_s21 + $0x10] sm:$0xff] }
  0x25   : > { %629 = vmatprep.subr.bf16.mxu1 %v864_v48  ;;  %v866_v48 = vcombine.high %v192_v42, %v196_v43  ;;  %v180_v59 = vld [vmem:[%s976_s21 + $0x30] sm:$0xff]  ;;  %v177_v60 = vld [vmem:[%s976_s21 + $0x18] sm:$0xff] }
  0x26   : > { %v849_v3 = vcombine.low %v176_v58, %v180_v59 }
  0x27   : > { %587 = vmatpush1.bf16.msra.mxu0 %v861_v53  ;;  %v189_v53 = vld [vmem:[%s976_s21 + $0x78] sm:$0xff] }
  0x28   : > { %630 = vmatpush1.bf16.msra.mxu1 %v863_v54  ;;  %588 = vmatprep.subr.bf16.mxu0 %v854_v55  ;;  %v865_v54 = vcombine.low %v192_v42, %v196_v43  ;;  %v867_v55 = vcombine.low %v193_v44, %v197_v45  ;;  %v860_v57 = vcombine.high %v185_v52, %v189_v53 }
  0x29   : > { %631 = vmatprep.subr.bf16.mxu1 %v856_v56  ;;  %v858_v56 = vcombine.high %v184_v50, %v188_v51 }
  0x2b   : > { %589 = vmatpush1.bf16.msra.mxu0 %v853_v61  ;;  %v181_v61 = vld [vmem:[%s976_s21 + $0x38] sm:$0xff] }
  0x2c   : > { %632 = vmatpush1.bf16.msra.mxu1 %v855_v62  ;;  %590 = vmatprep.subr.bf16.mxu0 %v846_v63  ;;  %v857_v62 = vcombine.low %v184_v50, %v188_v51  ;;  %v859_v63 = vcombine.low %v185_v52, %v189_v53  ;;  %v852_v2 = vcombine.high %v177_v60, %v181_v61 }
  0x2d   : > { %633 = vmatprep.subr.bf16.mxu1 %v848_v1  ;;  %v850_v1 = vcombine.high %v176_v58, %v180_v59  ;;  %v851_v4 = vcombine.low %v177_v60, %v181_v61 }
  0x2f   : > { %591 = vmatpush1.bf16.msra.mxu0 %v845_v6 }
  0x30   : > { %634 = vmatpush1.bf16.msra.mxu1 %v847_v7  ;;  %662 = vmatprep.subr.bf16.mxu0 %v906_v8 }
  0x31   : > { %705 = vmatprep.subr.bf16.mxu1 %v908_v9 }
  0x32   : > { %609 = vmatmul.mubr.bf16.vlgmr.msra.gmra.mxu0 %v1019_v12 }
  0x33   : > { %652 = vmatmul.mubr.bf16.vlgmr.msra.gmra.mxu1 %v1019_v12  ;;  %663 = vmatpush1.bf16.msra.mxu0 %v905_v15 }
  0x34   : > { %706 = vmatpush1.bf16.msra.mxu1 %v907_v16  ;;  %664 = vmatprep.subr.bf16.mxu0 %v898_v17 }
  0x35   : > { %707 = vmatprep.subr.bf16.mxu1 %v900_v18  ;;  %694 = vmatprep.mubr.bf16.mxu0 %v932_v0 }
  0x36   : > { %737 = vmatprep.mubr.bf16.mxu1 %v932_v0  ;;  %v883_v0 = vcombine.low %v209_v29, %v213_v30 }
  0x37   : > { %665 = vmatpush1.bf16.msra.mxu0 %v897_v23 }
  0x38   : > { %708 = vmatpush1.bf16.msra.mxu1 %v899_v24  ;;  %666 = vmatprep.subr.bf16.mxu0 %v890_v25 }
  0x39   : > { %709 = vmatprep.subr.bf16.mxu1 %v892_v26 }
  0x3b   : > { %667 = vmatpush1.bf16.msra.mxu0 %v889_v31 }
  0x3c   : > { %710 = vmatpush1.bf16.msra.mxu1 %v891_v32  ;;  %668 = vmatprep.subr.bf16.mxu0 %v882_v33 }
  0x3d   : > { %711 = vmatprep.subr.bf16.mxu1 %v884_v34 }
  0x3f   : > { %669 = vmatpush1.bf16.msra.mxu0 %v881_v39 }
  0x40   : > { %712 = vmatpush1.bf16.msra.mxu1 %v883_v0  ;;  %670 = vmatprep.subr.bf16.mxu0 %v874_v40 }
  0x41   : > { %713 = vmatprep.subr.bf16.mxu1 %v876_v41 }
  0x43   : > { %671 = vmatpush1.bf16.msra.mxu0 %v873_v46 }
  0x44   : > { %714 = vmatpush1.bf16.msra.mxu1 %v875_v47  ;;  %672 = vmatprep.subr.bf16.mxu0 %v866_v48 }
  0x45   : > { %715 = vmatprep.subr.bf16.mxu1 %v868_v49 }
  0x47   : > { %673 = vmatpush1.bf16.msra.mxu0 %v865_v54 }
  0x48   : > { %716 = vmatpush1.bf16.msra.mxu1 %v867_v55  ;;  %674 = vmatprep.subr.bf16.mxu0 %v858_v56 }
  0x49   : > { %717 = vmatprep.subr.bf16.mxu1 %v860_v57 }
  0x4b   : > { %675 = vmatpush1.bf16.msra.mxu0 %v857_v62 }
  0x4c   : > { %718 = vmatpush1.bf16.msra.mxu1 %v859_v63  ;;  %676 = vmatprep.subr.bf16.mxu0 %v850_v1 }
  0x4d   : > { %719 = vmatprep.subr.bf16.mxu1 %v852_v2 }
  0x4f   : > { %677 = vmatpush1.bf16.msra.mxu0 %v849_v3 }
  0x50   : > { %720 = vmatpush1.bf16.msra.mxu1 %v851_v4 }
  0x52   : > { %695 = vmatmul.mubr.bf16.vlgmr.msra.gmra.mxu0 %v1019_v12 }
  0x53   : > { %738 = vmatmul.mubr.bf16.vlgmr.msra.gmra.mxu1 %v1019_v12 }
  0x89   : > { %v243_v5 = vpop.permute.xlu0 %242 }
  0x8d   : > { %v248_v11 = vpop.permute.xlu0 %247 }
  0xf2   : > { %v610_v6 = vpop.f32.mrf.mxu0 }
  0xf3   : > { %v611_v7 = vadd.f32 %v610_v6, %v243_v5  ;;  %v653_v8 = vpop.f32.mrf.mxu1 }
  0xf4   : > { %v654_v9 = vadd.f32 %v653_v8, %v243_v5  ;;  %v612_v10 = vpop.f32.mrf.mxu0 }
  0xf5   : > { %v748_v13 = vmax.f32 %v611_v7, 0.0  ;;  %v613_v14 = vadd.f32 %v612_v10, %v243_v5  ;;  %v655_v15 = vpop.f32.mrf.mxu1 }
  0xf6   : > { %v750_v12 = vmax.f32 %v654_v9, 0.0  ;;  %v656_v16 = vadd.f32 %v655_v15, %v243_v5  ;;  %v614_v17 = vpop.f32.mrf.mxu0 }
  0xf7   : > { %764 = vst [vmem:[%s1057_s27] sm:$0xff] %v748_v13  ;;  %v749_v18 = vmax.f32 %v613_v14, 0.0  ;;  %v615_v19 = vadd.f32 %v614_v17, %v248_v11  ;;  %v657_v20 = vpop.f32.mrf.mxu1 }
  0xf8   : > { %766 = vst [vmem:[%s1057_s27 + $0x10] sm:$0xff] %v750_v12  ;;  %v751_v21 = vmax.f32 %v656_v16, 0.0  ;;  %v658_v22 = vadd.f32 %v657_v20, %v248_v11  ;;  %v616_v23 = vpop.f32.mrf.mxu0 }
  0xf9   : > { %765 = vst [vmem:[%s1057_s27 + $0x8] sm:$0xff] %v749_v18  ;;  %v756_v24 = vmax.f32 %v615_v19, 0.0  ;;  %v617_v25 = vadd.f32 %v616_v23, %v248_v11  ;;  %v659_v26 = vpop.f32.mrf.mxu1 }
  0xfa   : > { %767 = vst [vmem:[%s1057_s27 + $0x18] sm:$0xff] %v751_v21  ;;  %v758_v27 = vmax.f32 %v658_v22, 0.0  ;;  %v660_v28 = vadd.f32 %v659_v26, %v248_v11 }
  0xfb   : > { %772 = vst [vmem:[%s1057_s27 + $0x40] sm:$0xff] %v756_v24  ;;  %v757_v29 = vmax.f32 %v617_v25, 0.0 }
  0xfc   : > { %774 = vst [vmem:[%s1057_s27 + $0x50] sm:$0xff] %v758_v27  ;;  %v759_v30 = vmax.f32 %v660_v28, 0.0 }
  0xfd   : > { %773 = vst [vmem:[%s1057_s27 + $0x48] sm:$0xff] %v757_v29 }
  0xfe   : > { %775 = vst [vmem:[%s1057_s27 + $0x58] sm:$0xff] %v759_v30 }
 0x112   : > { %v696_v31 = vpop.f32.mrf.mxu0 }
 0x113   : > { %v697_v32 = vadd.f32 %v696_v31, %v243_v5  ;;  %v739_v33 = vpop.f32.mrf.mxu1 }
 0x114   : > { %v740_v34 = vadd.f32 %v739_v33, %v243_v5  ;;  %v698_v35 = vpop.f32.mrf.mxu0 }
 0x115   : > { %v752_v36 = vmax.f32 %v697_v32, 0.0  ;;  %v699_v37 = vadd.f32 %v698_v35, %v243_v5  ;;  %v741_v38 = vpop.f32.mrf.mxu1 }
 0x116   : > { %v754_v39 = vmax.f32 %v740_v34, 0.0  ;;  %v742_v0 = vadd.f32 %v741_v38, %v243_v5  ;;  %v700_v40 = vpop.f32.mrf.mxu0 }
 0x117   : > { %768 = vst [vmem:[%s1057_s27 + $0x20] sm:$0xff] %v752_v36  ;;  %v753_v41 = vmax.f32 %v699_v37, 0.0  ;;  %v701_v42 = vadd.f32 %v700_v40, %v248_v11  ;;  %v743_v43 = vpop.f32.mrf.mxu1 }
 0x118   : > { %770 = vst [vmem:[%s1057_s27 + $0x30] sm:$0xff] %v754_v39  ;;  %v755_v44 = vmax.f32 %v742_v0, 0.0  ;;  %v744_v45 = vadd.f32 %v743_v43, %v248_v11  ;;  %v702_v46 = vpop.f32.mrf.mxu0 }
 0x119   : > { %769 = vst [vmem:[%s1057_s27 + $0x28] sm:$0xff] %v753_v41  ;;  %v760_v47 = vmax.f32 %v701_v42, 0.0  ;;  %v703_v48 = vadd.f32 %v702_v46, %v248_v11  ;;  %v745_v49 = vpop.f32.mrf.mxu1 }
 0x11a   : > { %771 = vst [vmem:[%s1057_s27 + $0x38] sm:$0xff] %v755_v44  ;;  %v762_v50 = vmax.f32 %v744_v45, 0.0  ;;  %v746_v51 = vadd.f32 %v745_v49, %v248_v11 }
 0x11b   : > { %776 = vst [vmem:[%s1057_s27 + $0x60] sm:$0xff] %v760_v47  ;;  %v761_v52 = vmax.f32 %v703_v48, 0.0 }
 0x11c   : > { %778 = vst [vmem:[%s1057_s27 + $0x70] sm:$0xff] %v762_v50  ;;  %v763_v53 = vmax.f32 %v746_v51, 0.0 }
 0x11d   : > { %777 = vst [vmem:[%s1057_s27 + $0x68] sm:$0xff] %v761_v52 }
 0x11e   : > { %779 = vst [vmem:[%s1057_s27 + $0x78] sm:$0xff] %v763_v53 }
 0x11f PF: > { %s13_s12 = sadd.s32 1, %s930_s12  }
 0x120   : > { %p10_p4 = scmp.ge.s32.totalorder %s13_s12, 4  }
 0x122   :  { %12 = sbr.rel (!%p10_p4) target bundleno = 1 (0x1), region = 62 }

// kernel: merged_forward.4
= control target key start
LH: loop header
LB: loop body
LE: loop exit
PB: predicated region body
PF: predicated region fallthrough
CT: control target
= control target key end

     0   :  { %s1449_s12 = smov 0   ;;  %s1668_s0 = inlined_call_operand.vmem [shape: bf16[24,256], index: 0, kind: input, shape index: {}]   ;;  %s1669_s1 = inlined_call_operand.vmem [shape: bf16[2,256,1024], index: 1, kind: input, shape index: {}]   ;;  %s1670_s2 = inlined_call_operand.vmem [shape: f32[24,1], index: 2, kind: input, shape index: {}]   ;;  %s1671_s3 = inlined_call_operand.vmem [shape: f32[2,24,1024], index: 3, kind: output, shape index: {}]  }
   0x1 LB: > { %s1260_s13 = sadd.s32 4294967295, %s1426_s12   ;;  %p1264_p0 = scmp.ge.s32.totalorder %s1426_s12, 1  ;;  %s1426_s12 = sphi %s1449_s12, %s13_s12  }
   0x2   : > { %p137_p1 = scmp.lt.s32.totalorder %s1426_s12, 3 }
   0x4   : > { %p138_p2 = pnand %p1264_p0, %p137_p1 }
   0x5   : > { %p161_p3 = scmp.lt.s32.totalorder (!%p138_p2), %s1260_s13, 1 }
   0x6   : > { %141 = sbr.rel (%p138_p2) target bundleno = 353 (0x161), region = 32 }
   0xb   : > { %v1460_v0 = vld [vmem:[%s1668_s0 + $0x4] ss:$8 sps:$4 sm:$0xff]   ;;  %s1673_s13 = smov (!%p161_p3, %s1260_s13), 1  ;;  %v1428_v27 = vmov 0  }
   0xc   : > { %1009 = vmatprep.mubr.bf16.mxu0 %v1460_v0  ;;  %1060 = vmatprep.mubr.bf16.mxu1 %v1460_v0  ;;  %s1402_s16 = sshll.u32 %s1673_s13, 10  ;;  %s1403_s30 = smul.u32 192, %s1673_s13 }
   0xd   : > { %s1470_s19 = scalar_lea.vmem %s1669_s1, %s1402_s16  ;;  %1413 = vset.pattern.permute.xlu0 %v1428_v27  ;;  %1414 = vset.pattern.permute.xlu1 %v1428_v27 }
   0xe   : > { %v230_v1 = vld [vmem:[%s1470_s19 + $0x1c0] sm:$0xff]  ;;  %v231_v3 = vld [vmem:[%s1470_s19 + $0x1c8] sm:$0xff]  ;;  %s1639_s6 = scalar_lea.vmem %s1671_s3, %s1403_s30 }
   0xf   : > { %v234_v2 = vld [vmem:[%s1470_s19 + $0x1e0] sm:$0xff]  ;;  %v235_v5 = vld [vmem:[%s1470_s19 + $0x1e8] sm:$0xff] }
  0x10   : > { %v1329_v4 = vcombine.high %v230_v1, %v234_v2  ;;  %v1328_v6 = vcombine.low %v230_v1, %v234_v2  ;;  %v222_v7 = vld [vmem:[%s1470_s19 + $0x180] sm:$0xff]  ;;  %v1331_v9 = vcombine.high %v231_v3, %v235_v5  ;;  %v1330_v10 = vcombine.low %v231_v3, %v235_v5  ;;  %v223_v12 = vld [vmem:[%s1470_s19 + $0x188] sm:$0xff] }
  0x11   : > { %v226_v8 = vld [vmem:[%s1470_s19 + $0x1a0] sm:$0xff]  ;;  %v227_v13 = vld [vmem:[%s1470_s19 + $0x1a8] sm:$0xff] }
  0x12   : > { %v1321_v11 = vcombine.high %v222_v7, %v226_v8  ;;  %v214_v14 = vld [vmem:[%s1470_s19 + $0x140] sm:$0xff]  ;;  %977 = vmatprep.subr.bf16.mxu0 %v1329_v4  ;;  %v1323_v15 = vcombine.high %v223_v12, %v227_v13  ;;  %v215_v17 = vld [vmem:[%s1470_s19 + $0x148] sm:$0xff]  ;;  %1028 = vmatprep.subr.bf16.mxu1 %v1331_v9  ;;  %v1320_v19 = vcombine.low %v222_v7, %v226_v8 }
  0x13   : > { %v218_v16 = vld [vmem:[%s1470_s19 + $0x160] sm:$0xff]  ;;  %v219_v18 = vld [vmem:[%s1470_s19 + $0x168] sm:$0xff]  ;;  %978 = vmatpush1.bf16.msra.mxu0 %v1328_v6  ;;  %1029 = vmatpush1.bf16.msra.mxu1 %v1330_v10  ;;  %v1322_v20 = vcombine.low %v223_v12, %v227_v13 }
  0x14   : > { %979 = vmatprep.subr.bf16.mxu0 %v1321_v11  ;;  %v1313_v21 = vcombine.high %v214_v14, %v218_v16  ;;  %1030 = vmatprep.subr.bf16.mxu1 %v1323_v15  ;;  %v1315_v22 = vcombine.high %v215_v17, %v219_v18  ;;  %v206_v23 = vld [vmem:[%s1470_s19 + $0x100] sm:$0xff]  ;;  %v207_v25 = vld [vmem:[%s1470_s19 + $0x108] sm:$0xff]  ;;  %v1312_v28 = vcombine.low %v214_v14, %v218_v16 }
  0x15   : > { %v210_v24 = vld [vmem:[%s1470_s19 + $0x120] sm:$0xff]  ;;  %v211_v26 = vld [vmem:[%s1470_s19 + $0x128] sm:$0xff]  ;;  %v1314_v29 = vcombine.low %v215_v17, %v219_v18 }
  0x16   : > { %v1305_v30 = vcombine.high %v206_v23, %v210_v24  ;;  %v1307_v31 = vcombine.high %v207_v25, %v211_v26  ;;  %v198_v32 = vld [vmem:[%s1470_s19 + $0xc0] sm:$0xff]  ;;  %v199_v34 = vld [vmem:[%s1470_s19 + $0xc8] sm:$0xff]  ;;  %v1304_v36 = vcombine.low %v206_v23, %v210_v24  ;;  %v1306_v37 = vcombine.low %v207_v25, %v211_v26 }
  0x17   : > { %980 = vmatpush1.bf16.msra.mxu0 %v1320_v19  ;;  %1031 = vmatpush1.bf16.msra.mxu1 %v1322_v20  ;;  %v202_v33 = vld [vmem:[%s1470_s19 + $0xe0] sm:$0xff]  ;;  %v203_v35 = vld [vmem:[%s1470_s19 + $0xe8] sm:$0xff] }
  0x18   : > { %981 = vmatprep.subr.bf16.mxu0 %v1313_v21  ;;  %1032 = vmatprep.subr.bf16.mxu1 %v1315_v22  ;;  %v1297_v38 = vcombine.high %v198_v32, %v202_v33  ;;  %v1299_v39 = vcombine.high %v199_v34, %v203_v35  ;;  %v190_v40 = vld [vmem:[%s1470_s19 + $0x80] sm:$0xff]  ;;  %v191_v42 = vld [vmem:[%s1470_s19 + $0x88] sm:$0xff]  ;;  %v1296_v44 = vcombine.low %v198_v32, %v202_v33 }
  0x19   : > { %v194_v41 = vld [vmem:[%s1470_s19 + $0xa0] sm:$0xff]  ;;  %v195_v43 = vld [vmem:[%s1470_s19 + $0xa8] sm:$0xff]  ;;  %v1298_v45 = vcombine.low %v199_v34, %v203_v35 }
  0x1a   : > { %v1289_v46 = vcombine.high %v190_v40, %v194_v41  ;;  %v1291_v47 = vcombine.high %v191_v42, %v195_v43  ;;  %v182_v48 = vld [vmem:[%s1470_s19 + $0x40] sm:$0xff]  ;;  %v183_v50 = vld [vmem:[%s1470_s19 + $0x48] sm:$0xff]  ;;  %v1288_v52 = vcombine.low %v190_v40, %v194_v41  ;;  %v1290_v53 = vcombine.low %v191_v42, %v195_v43 }
  0x1b   : > { %982 = vmatpush1.bf16.msra.mxu0 %v1312_v28  ;;  %1033 = vmatpush1.bf16.msra.mxu1 %v1314_v29  ;;  %v186_v49 = vld [vmem:[%s1470_s19 + $0x60] sm:$0xff]  ;;  %v187_v51 = vld [vmem:[%s1470_s19 + $0x68] sm:$0xff] }
  0x1c   : > { %983 = vmatprep.subr.bf16.mxu0 %v1305_v30  ;;  %1034 = vmatprep.subr.bf16.mxu1 %v1307_v31  ;;  %v1281_v54 = vcombine.high %v182_v48, %v186_v49  ;;  %v1283_v55 = vcombine.high %v183_v50, %v187_v51  ;;  %v174_v56 = vld [vmem:[%s1470_s19] sm:$0xff]  ;;  %v175_v58 = vld [vmem:[%s1470_s19 + $0x8] sm:$0xff]  ;;  %v1280_v60 = vcombine.low %v182_v48, %v186_v49 }
  0x1d   : > { %v178_v57 = vld [vmem:[%s1470_s19 + $0x20] sm:$0xff]  ;;  %v179_v59 = vld [vmem:[%s1470_s19 + $0x28] sm:$0xff]  ;;  %v1282_v61 = vcombine.low %v183_v50, %v187_v51 }
  0x1e   : > { %v1273_v62 = vcombine.high %v174_v56, %v178_v57  ;;  %v1275_v63 = vcombine.high %v175_v58, %v179_v59  ;;  %v294_v1 = vld [vmem:[%s1470_s19 + $0x3c0] sm:$0xff]  ;;  %v295_v3 = vld [vmem:[%s1470_s19 + $0x3c8] sm:$0xff]  ;;  %v1272_v5 = vcombine.low %v174_v56, %v178_v57  ;;  %v1274_v6 = vcombine.low %v175_v58, %v179_v59 }
  0x1f   : > { %984 = vmatpush1.bf16.msra.mxu0 %v1304_v36  ;;  %1035 = vmatpush1.bf16.msra.mxu1 %v1306_v37  ;;  %v298_v2 = vld [vmem:[%s1470_s19 + $0x3e0] sm:$0xff]  ;;  %v299_v4 = vld [vmem:[%s1470_s19 + $0x3e8] sm:$0xff] }
  0x20   : > { %985 = vmatprep.subr.bf16.mxu0 %v1297_v38  ;;  %1036 = vmatprep.subr.bf16.mxu1 %v1299_v39  ;;  %v1393_v7 = vcombine.high %v294_v1, %v298_v2  ;;  %v1395_v8 = vcombine.high %v295_v3, %v299_v4  ;;  %v286_v9 = vld [vmem:[%s1470_s19 + $0x380] sm:$0xff]  ;;  %v287_v11 = vld [vmem:[%s1470_s19 + $0x388] sm:$0xff]  ;;  %v1392_v13 = vcombine.low %v294_v1, %v298_v2  ;;  %v304_v38 = vld [vmem:[%s1670_s2 + $0x10] sm:$0xff] }
  0x21   : > { %v290_v10 = vld [vmem:[%s1470_s19 + $0x3a0] sm:$0xff]  ;;  %v291_v12 = vld [vmem:[%s1470_s19 + $0x3a8] sm:$0xff]  ;;  %v1394_v14 = vcombine.low %v295_v3, %v299_v4  ;;  %317 = vperm.xlu1 %1414, %v304_v38  }
  0x22   : > { %v1385_v15 = vcombine.high %v286_v9, %v290_v10  ;;  %v1387_v16 = vcombine.high %v287_v11, %v291_v12  ;;  %v278_v17 = vld [vmem:[%s1470_s19 + $0x340] sm:$0xff]  ;;  %v279_v19 = vld [vmem:[%s1470_s19 + $0x348] sm:$0xff]  ;;  %v1384_v21 = vcombine.low %v286_v9, %v290_v10  ;;  %v1386_v22 = vcombine.low %v287_v11, %v291_v12 }
  0x23   : > { %986 = vmatpush1.bf16.msra.mxu0 %v1296_v44  ;;  %1037 = vmatpush1.bf16.msra.mxu1 %v1298_v45  ;;  %v282_v18 = vld [vmem:[%s1470_s19 + $0x360] sm:$0xff]  ;;  %v283_v20 = vld [vmem:[%s1470_s19 + $0x368] sm:$0xff] }
  0x24   : > { %987 = vmatprep.subr.bf16.mxu0 %v1289_v46  ;;  %1038 = vmatprep.subr.bf16.mxu1 %v1291_v47  ;;  %v1377_v23 = vcombine.high %v278_v17, %v282_v18  ;;  %v1379_v24 = vcombine.high %v279_v19, %v283_v20  ;;  %v270_v25 = vld [vmem:[%s1470_s19 + $0x300] sm:$0xff]  ;;  %v271_v27 = vld [vmem:[%s1470_s19 + $0x308] sm:$0xff]  ;;  %v1376_v29 = vcombine.low %v278_v17, %v282_v18  ;;  %v229_v17 = vld [vmem:[%s1470_s19 + $0x1b8] sm:$0xff] }
  0x25   : > { %v274_v26 = vld [vmem:[%s1470_s19 + $0x320] sm:$0xff]  ;;  %v275_v28 = vld [vmem:[%s1470_s19 + $0x328] sm:$0xff]  ;;  %v1378_v30 = vcombine.low %v279_v19, %v283_v20  ;;  %v173_v18 = vld [vmem:[%s1668_s0 + $0x10] sm:$0xff] }
  0x26   : > { %v1369_v31 = vcombine.high %v270_v25, %v274_v26  ;;  %v1371_v32 = vcombine.high %v271_v27, %v275_v28  ;;  %v262_v33 = vld [vmem:[%s1470_s19 + $0x2c0] sm:$0xff]  ;;  %v263_v36 = vld [vmem:[%s1470_s19 + $0x2c8] sm:$0xff]  ;;  %v1368_v39 = vcombine.low %v270_v25, %v274_v26  ;;  %v1370_v41 = vcombine.low %v271_v27, %v275_v28  ;;  %v217_v26 = vld [vmem:[%s1470_s19 + $0x158] sm:$0xff] }
  0x27   : > { %988 = vmatpush1.bf16.msra.mxu0 %v1288_v52  ;;  %1039 = vmatpush1.bf16.msra.mxu1 %v1290_v53  ;;  %v266_v34 = vld [vmem:[%s1470_s19 + $0x2e0] sm:$0xff]  ;;  %v267_v37 = vld [vmem:[%s1470_s19 + $0x2e8] sm:$0xff]  ;;  %v1563_v25 = vcombine.high %v173_v18, %v173_v18  ;;  %v221_v27 = vld [vmem:[%s1470_s19 + $0x178] sm:$0xff] }
  0x28   : > { %989 = vmatprep.subr.bf16.mxu0 %v1281_v54  ;;  %1040 = vmatprep.subr.bf16.mxu1 %v1283_v55  ;;  %v302_v35 = vld [vmem:[%s1670_s2] sm:$0xff]  ;;  %v303_v40 = vld [vmem:[%s1670_s2 + $0x8] sm:$0xff]  ;;  %v1361_v42 = vcombine.high %v262_v33, %v266_v34  ;;  %v1363_v43 = vcombine.high %v263_v36, %v267_v37  ;;  %v1360_v48 = vcombine.low %v262_v33, %v266_v34  ;;  %v212_v33 = vld [vmem:[%s1470_s19 + $0x130] sm:$0xff] }
  0x29   : > { %307 = vperm.xlu0 %1413, %v302_v35   ;;  %v254_v44 = vld [vmem:[%s1470_s19 + $0x280] sm:$0xff]  ;;  %v255_v46 = vld [vmem:[%s1470_s19 + $0x288] sm:$0xff]  ;;  %v1362_v49 = vcombine.low %v263_v36, %v267_v37  ;;  %v209_v34 = vld [vmem:[%s1470_s19 + $0x118] sm:$0xff]  ;;  %v1575_v36 = vcombine.low %v173_v18, %v173_v18  ;;  %v1318_v38 = vcombine.low %v217_v26, %v221_v27 }
  0x2a   : > { %v258_v45 = vld [vmem:[%s1470_s19 + $0x2a0] sm:$0xff]  ;;  %v259_v47 = vld [vmem:[%s1470_s19 + $0x2a8] sm:$0xff]  ;;  %v213_v35 = vld [vmem:[%s1470_s19 + $0x138] sm:$0xff] }
  0x2b   : > { %990 = vmatpush1.bf16.msra.mxu0 %v1280_v60  ;;  %1041 = vmatpush1.bf16.msra.mxu1 %v1282_v61  ;;  %v1353_v50 = vcombine.high %v254_v44, %v258_v45  ;;  %v1355_v51 = vcombine.high %v255_v46, %v259_v47  ;;  %v246_v52 = vld [vmem:[%s1470_s19 + $0x240] sm:$0xff]  ;;  %v247_v54 = vld [vmem:[%s1470_s19 + $0x248] sm:$0xff]  ;;  %v1352_v56 = vcombine.low %v254_v44, %v258_v45  ;;  %v205_v44 = vld [vmem:[%s1470_s19 + $0xf8] sm:$0xff] }
  0x2c   : > { %991 = vmatprep.subr.bf16.mxu0 %v1273_v62  ;;  %1042 = vmatprep.subr.bf16.mxu1 %v1275_v63  ;;  %v250_v53 = vld [vmem:[%s1470_s19 + $0x260] sm:$0xff]  ;;  %v251_v55 = vld [vmem:[%s1470_s19 + $0x268] sm:$0xff]  ;;  %v1354_v57 = vcombine.low %v255_v46, %v259_v47  ;;  %v1310_v46 = vcombine.low %v209_v34, %v213_v35  ;;  %v288_v18 = vld [vmem:[%s1470_s19 + $0x390] sm:$0xff] }
  0x2d   : > { %312 = vperm.xlu0 %1413, %v303_v40   ;;  %v1345_v58 = vcombine.high %v246_v52, %v250_v53  ;;  %v1347_v59 = vcombine.high %v247_v54, %v251_v55  ;;  %v238_v60 = vld [vmem:[%s1470_s19 + $0x200] sm:$0xff]  ;;  %v239_v62 = vld [vmem:[%s1470_s19 + $0x208] sm:$0xff]  ;;  %v1344_v1 = vcombine.low %v246_v52, %v250_v53  ;;  %v1346_v2 = vcombine.low %v247_v54, %v251_v55  ;;  %v197_v52 = vld [vmem:[%s1470_s19 + $0xb8] sm:$0xff] }
  0x2e   : > { %v242_v61 = vld [vmem:[%s1470_s19 + $0x220] sm:$0xff]  ;;  %v243_v63 = vld [vmem:[%s1470_s19 + $0x228] sm:$0xff]  ;;  %v1311_v40 = vcombine.high %v209_v34, %v213_v35  ;;  %v272_v35 = vld [vmem:[%s1470_s19 + $0x310] sm:$0xff] }
  0x2f   : > { %992 = vmatpush1.bf16.msra.mxu0 %v1272_v5  ;;  %1043 = vmatpush1.bf16.msra.mxu1 %v1274_v6  ;;  %v1337_v3 = vcombine.high %v238_v60, %v242_v61  ;;  %v1339_v4 = vcombine.high %v239_v62, %v243_v63  ;;  %v232_v5 = vld [vmem:[%s1470_s19 + $0x1d0] sm:$0xff]  ;;  %v1336_v9 = vcombine.low %v238_v60, %v242_v61  ;;  %v1552_v12 = vld [vmem:[%s1668_s0] ss:$8 sps:$4 sm:$0xff]   ;;  %v189_v60 = vld [vmem:[%s1470_s19 + $0x78] sm:$0xff] }
  0x30   : > { %993 = vmatprep.subr.bf16.mxu0 %v1393_v7  ;;  %1044 = vmatprep.subr.bf16.mxu1 %v1395_v8  ;;  %v236_v6 = vld [vmem:[%s1470_s19 + $0x1f0] sm:$0xff]  ;;  %v233_v7 = vld [vmem:[%s1470_s19 + $0x1d8] sm:$0xff]  ;;  %v1338_v10 = vcombine.low %v239_v62, %v243_v63 }
  0x31   : > { %v237_v8 = vld [vmem:[%s1470_s19 + $0x1f8] sm:$0xff]  ;;  %v1333_v11 = vcombine.high %v232_v5, %v236_v6  ;;  %v1332_v19 = vcombine.low %v232_v5, %v236_v6 }
  0x32   : > { %v1334_v20 = vcombine.low %v233_v7, %v237_v8 }
  0x33   : > { %994 = vmatpush2.bf16.msra.mxu0 %v1392_v13  ;;  %1045 = vmatpush2.bf16.msra.mxu1 %v1394_v14  ;;  %v1335_v13 = vcombine.high %v233_v7, %v237_v8  ;;  %v224_v14 = vld [vmem:[%s1470_s19 + $0x190] sm:$0xff] }
  0x34   : > { %995 = vmatprep.subr.bf16.mxu0 %v1385_v15  ;;  %1046 = vmatprep.subr.bf16.mxu1 %v1387_v16  ;;  %v228_v15 = vld [vmem:[%s1470_s19 + $0x1b0] sm:$0xff]  ;;  %v225_v16 = vld [vmem:[%s1470_s19 + $0x198] sm:$0xff] }
  0x35   : > { %v1324_v28 = vcombine.low %v224_v14, %v228_v15 }
  0x37   : > { %996 = vmatpush2.bf16.msra.mxu0 %v1384_v21  ;;  %1047 = vmatpush2.bf16.msra.mxu1 %v1386_v22  ;;  %v1325_v21 = vcombine.high %v224_v14, %v228_v15  ;;  %v1327_v22 = vcombine.high %v225_v16, %v229_v17 }
  0x38   : > { %997 = vmatprep.subr.bf16.mxu0 %v1377_v23  ;;  %1048 = vmatprep.subr.bf16.mxu1 %v1379_v24  ;;  %v216_v23 = vld [vmem:[%s1470_s19 + $0x150] sm:$0xff] }
  0x39   : > { %v220_v24 = vld [vmem:[%s1470_s19 + $0x170] sm:$0xff] }
  0x3a   : > { %v1316_v37 = vcombine.low %v216_v23, %v220_v24 }
  0x3b   : > { %998 = vmatpush2.bf16.msra.mxu0 %v1376_v29  ;;  %1049 = vmatpush2.bf16.msra.mxu1 %v1378_v30  ;;  %v1326_v29 = vcombine.low %v225_v16, %v229_v17  ;;  %v1317_v30 = vcombine.high %v216_v23, %v220_v24 }
  0x3c   : > { %999 = vmatprep.subr.bf16.mxu0 %v1369_v31  ;;  %1050 = vmatprep.subr.bf16.mxu1 %v1371_v32  ;;  %v1319_v31 = vcombine.high %v217_v26, %v221_v27  ;;  %v208_v32 = vld [vmem:[%s1470_s19 + $0x110] sm:$0xff] }
  0x3d   : > { %v1308_v45 = vcombine.low %v208_v32, %v212_v33  ;;  %v280_v27 = vld [vmem:[%s1470_s19 + $0x350] sm:$0xff] }
  0x3f   : > { %1000 = vmatpush2.bf16.msra.mxu0 %v1368_v39  ;;  %1051 = vmatpush2.bf16.msra.mxu1 %v1370_v41  ;;  %v1309_v39 = vcombine.high %v208_v32, %v212_v33  ;;  %v200_v41 = vld [vmem:[%s1470_s19 + $0xd0] sm:$0xff] }
  0x40   : > { %1001 = vmatprep.subr.bf16.mxu0 %v1361_v42  ;;  %1052 = vmatprep.subr.bf16.mxu1 %v1363_v43  ;;  %v204_v42 = vld [vmem:[%s1470_s19 + $0xf0] sm:$0xff]  ;;  %v201_v43 = vld [vmem:[%s1470_s19 + $0xd8] sm:$0xff] }
  0x41   : > { %v1301_v47 = vcombine.high %v200_v41, %v204_v42  ;;  %v1300_v53 = vcombine.low %v200_v41, %v204_v42  ;;  %v1302_v54 = vcombine.low %v201_v43, %v205_v44 }
  0x43   : > { %1002 = vmatpush2.bf16.msra.mxu0 %v1360_v48  ;;  %1053 = vmatpush2.bf16.msra.mxu1 %v1362_v49  ;;  %v1303_v48 = vcombine.high %v201_v43, %v205_v44  ;;  %v192_v49 = vld [vmem:[%s1470_s19 + $0x90] sm:$0xff] }
  0x44   : > { %1003 = vmatprep.subr.bf16.mxu0 %v1353_v50  ;;  %1054 = vmatprep.subr.bf16.mxu1 %v1355_v51  ;;  %v196_v50 = vld [vmem:[%s1470_s19 + $0xb0] sm:$0xff]  ;;  %v193_v51 = vld [vmem:[%s1470_s19 + $0x98] sm:$0xff] }
  0x45   : > { %v1293_v55 = vcombine.high %v192_v49, %v196_v50  ;;  %v1292_v61 = vcombine.low %v192_v49, %v196_v50  ;;  %v264_v44 = vld [vmem:[%s1470_s19 + $0x2d0] sm:$0xff] }
  0x47   : > { %1004 = vmatpush2.bf16.msra.mxu0 %v1352_v56  ;;  %1055 = vmatpush2.bf16.msra.mxu1 %v1354_v57  ;;  %v1295_v56 = vcombine.high %v193_v51, %v197_v52  ;;  %v184_v57 = vld [vmem:[%s1470_s19 + $0x50] sm:$0xff] }
  0x48   : > { %1005 = vmatprep.subr.bf16.mxu0 %v1345_v58  ;;  %1056 = vmatprep.subr.bf16.mxu1 %v1347_v59  ;;  %v188_v58 = vld [vmem:[%s1470_s19 + $0x70] sm:$0xff]  ;;  %v185_v59 = vld [vmem:[%s1470_s19 + $0x58] sm:$0xff] }
  0x49   : > { %v1285_v62 = vcombine.high %v184_v57, %v188_v58  ;;  %v1287_v63 = vcombine.high %v185_v59, %v189_v60  ;;  %v1284_v5 = vcombine.low %v184_v57, %v188_v58  ;;  %v1286_v6 = vcombine.low %v185_v59, %v189_v60  ;;  %v248_v60 = vld [vmem:[%s1470_s19 + $0x250] sm:$0xff] }
  0x4b   : > { %1006 = vmatpush2.bf16.msra.mxu0 %v1344_v1  ;;  %1057 = vmatpush2.bf16.msra.mxu1 %v1346_v2  ;;  %v176_v1 = vld [vmem:[%s1470_s19 + $0x10] sm:$0xff] }
  0x4c   : > { %1007 = vmatprep.subr.bf16.mxu0 %v1337_v3  ;;  %1058 = vmatprep.subr.bf16.mxu1 %v1339_v4  ;;  %v180_v2 = vld [vmem:[%s1470_s19 + $0x30] sm:$0xff]  ;;  %v177_v3 = vld [vmem:[%s1470_s19 + $0x18] sm:$0xff] }
  0x4d   : > { %v181_v4 = vld [vmem:[%s1470_s19 + $0x38] sm:$0xff]  ;;  %v1277_v7 = vcombine.high %v176_v1, %v180_v2  ;;  %v1276_v14 = vcombine.low %v176_v1, %v180_v2 }
  0x4e   : > { %v1279_v8 = vcombine.high %v177_v3, %v181_v4  ;;  %v1278_v15 = vcombine.low %v177_v3, %v181_v4  ;;  %v240_v4 = vld [vmem:[%s1470_s19 + $0x210] sm:$0xff] }
  0x4f   : > { %1008 = vmatpush2.bf16.msra.mxu0 %v1336_v9  ;;  %1059 = vmatpush2.bf16.msra.mxu1 %v1338_v10  ;;  %v296_v9 = vld [vmem:[%s1470_s19 + $0x3d0] sm:$0xff] }
  0x50   : > { %1079 = vmatprep.subr.bf16.mxu0 %v1333_v11  ;;  %1130 = vmatprep.subr.bf16.mxu1 %v1335_v13  ;;  %v300_v10 = vld [vmem:[%s1470_s19 + $0x3f0] sm:$0xff]  ;;  %v297_v11 = vld [vmem:[%s1470_s19 + $0x3d8] sm:$0xff] }
  0x51   : > { %v301_v13 = vld [vmem:[%s1470_s19 + $0x3f8] sm:$0xff]  ;;  %v1397_v16 = vcombine.high %v296_v9, %v300_v10 }
  0x52   : > { %1010 = vmatmul.mubr.bf16.vlgmr.msra.gmra.mxu0 %v1552_v12  ;;  %1061 = vmatmul.mubr.bf16.vlgmr.msra.gmra.mxu1 %v1552_v12  ;;  %v1399_v17 = vcombine.high %v297_v11, %v301_v13  ;;  %v1398_v23 = vcombine.low %v297_v11, %v301_v13 }
  0x53   : > { %1080 = vmatpush1.bf16.msra.mxu0 %v1332_v19  ;;  %1131 = vmatpush1.bf16.msra.mxu1 %v1334_v20  ;;  %v292_v19 = vld [vmem:[%s1470_s19 + $0x3b0] sm:$0xff]  ;;  %v289_v20 = vld [vmem:[%s1470_s19 + $0x398] sm:$0xff] }
  0x54   : > { %1081 = vmatprep.subr.bf16.mxu0 %v1325_v21  ;;  %1132 = vmatprep.subr.bf16.mxu1 %v1327_v22  ;;  %v293_v21 = vld [vmem:[%s1470_s19 + $0x3b8] sm:$0xff]  ;;  %v1396_v22 = vcombine.low %v296_v9, %v300_v10  ;;  %v1389_v24 = vcombine.high %v288_v18, %v292_v19 }
  0x55   : > { %1019 = vmatprep.mubr.bf16.mxu0 %v1563_v25  ;;  %1070 = vmatprep.mubr.bf16.mxu1 %v1563_v25  ;;  %v1391_v26 = vcombine.high %v289_v20, %v293_v21  ;;  %v1390_v32 = vcombine.low %v289_v20, %v293_v21 }
  0x57   : > { %1082 = vmatpush1.bf16.msra.mxu0 %v1324_v28  ;;  %1133 = vmatpush1.bf16.msra.mxu1 %v1326_v29  ;;  %v284_v28 = vld [vmem:[%s1470_s19 + $0x370] sm:$0xff]  ;;  %v281_v29 = vld [vmem:[%s1470_s19 + $0x358] sm:$0xff] }
  0x58   : > { %1083 = vmatprep.subr.bf16.mxu0 %v1317_v30  ;;  %1134 = vmatprep.subr.bf16.mxu1 %v1319_v31  ;;  %v285_v30 = vld [vmem:[%s1470_s19 + $0x378] sm:$0xff]  ;;  %v1388_v31 = vcombine.low %v288_v18, %v292_v19  ;;  %v1381_v33 = vcombine.high %v280_v27, %v284_v28 }
  0x59   : > { %v1383_v34 = vcombine.high %v281_v29, %v285_v30  ;;  %v1382_v41 = vcombine.low %v281_v29, %v285_v30 }
  0x5a   : > { %1020 = vmatmul.mubr.bf16.gmra.mxu0 %v1575_v36  ;;  %1071 = vmatmul.mubr.bf16.gmra.mxu1 %v1575_v36 }
  0x5b   : > { %1084 = vmatpush1.bf16.msra.mxu0 %v1316_v37  ;;  %1135 = vmatpush1.bf16.msra.mxu1 %v1318_v38  ;;  %v276_v37 = vld [vmem:[%s1470_s19 + $0x330] sm:$0xff]  ;;  %v273_v38 = vld [vmem:[%s1470_s19 + $0x318] sm:$0xff] }
  0x5c   : > { %1085 = vmatprep.subr.bf16.mxu0 %v1309_v39  ;;  %1136 = vmatprep.subr.bf16.mxu1 %v1311_v40  ;;  %v277_v39 = vld [vmem:[%s1470_s19 + $0x338] sm:$0xff]  ;;  %v1380_v40 = vcombine.low %v280_v27, %v284_v28  ;;  %v1373_v42 = vcombine.high %v272_v35, %v276_v37 }
  0x5d   : > { %1111 = vmatprep.mubr.bf16.mxu0 %v1460_v0  ;;  %1162 = vmatprep.mubr.bf16.mxu1 %v1460_v0  ;;  %v1294_v0 = vcombine.low %v193_v51, %v197_v52  ;;  %v1375_v43 = vcombine.high %v273_v38, %v277_v39  ;;  %v1374_v49 = vcombine.low %v273_v38, %v277_v39  ;;  %v256_v52 = vld [vmem:[%s1470_s19 + $0x290] sm:$0xff] }
  0x5f   : > { %1086 = vmatpush1.bf16.msra.mxu0 %v1308_v45  ;;  %1137 = vmatpush1.bf16.msra.mxu1 %v1310_v46  ;;  %v268_v45 = vld [vmem:[%s1470_s19 + $0x2f0] sm:$0xff]  ;;  %v265_v46 = vld [vmem:[%s1470_s19 + $0x2d8] sm:$0xff] }
  0x60   : > { %1087 = vmatprep.subr.bf16.mxu0 %v1301_v47  ;;  %1138 = vmatprep.subr.bf16.mxu1 %v1303_v48  ;;  %v269_v47 = vld [vmem:[%s1470_s19 + $0x2f8] sm:$0xff]  ;;  %v1372_v48 = vcombine.low %v272_v35, %v276_v37  ;;  %v1365_v50 = vcombine.high %v264_v44, %v268_v45 }
  0x61   : > { %v1367_v51 = vcombine.high %v265_v46, %v269_v47  ;;  %v1366_v57 = vcombine.low %v265_v46, %v269_v47 }
  0x63   : > { %1088 = vmatpush1.bf16.msra.mxu0 %v1300_v53  ;;  %1139 = vmatpush1.bf16.msra.mxu1 %v1302_v54  ;;  %v260_v53 = vld [vmem:[%s1470_s19 + $0x2b0] sm:$0xff]  ;;  %v257_v54 = vld [vmem:[%s1470_s19 + $0x298] sm:$0xff] }
  0x64   : > { %1089 = vmatprep.subr.bf16.mxu0 %v1293_v55  ;;  %1140 = vmatprep.subr.bf16.mxu1 %v1295_v56  ;;  %v261_v55 = vld [vmem:[%s1470_s19 + $0x2b8] sm:$0xff]  ;;  %v1364_v56 = vcombine.low %v264_v44, %v268_v45  ;;  %v1357_v58 = vcombine.high %v256_v52, %v260_v53 }
  0x65   : > { %v1359_v59 = vcombine.high %v257_v54, %v261_v55  ;;  %v1358_v1 = vcombine.low %v257_v54, %v261_v55 }
  0x67   : > { %1090 = vmatpush1.bf16.msra.mxu0 %v1292_v61  ;;  %1141 = vmatpush1.bf16.msra.mxu1 %v1294_v0  ;;  %v252_v61 = vld [vmem:[%s1470_s19 + $0x270] sm:$0xff]  ;;  %v249_v0 = vld [vmem:[%s1470_s19 + $0x258] sm:$0xff] }
  0x68   : > { %1091 = vmatprep.subr.bf16.mxu0 %v1285_v62  ;;  %1142 = vmatprep.subr.bf16.mxu1 %v1287_v63  ;;  %v253_v62 = vld [vmem:[%s1470_s19 + $0x278] sm:$0xff]  ;;  %v1356_v63 = vcombine.low %v256_v52, %v260_v53  ;;  %v1349_v2 = vcombine.high %v248_v60, %v252_v61 }
  0x69   : > { %v1351_v3 = vcombine.high %v249_v0, %v253_v62  ;;  %v1350_v9 = vcombine.low %v249_v0, %v253_v62 }
  0x6b   : > { %1092 = vmatpush1.bf16.msra.mxu0 %v1284_v5  ;;  %1143 = vmatpush1.bf16.msra.mxu1 %v1286_v6  ;;  %v244_v5 = vld [vmem:[%s1470_s19 + $0x230] sm:$0xff]  ;;  %v241_v6 = vld [vmem:[%s1470_s19 + $0x218] sm:$0xff] }
  0x6c   : > { %1093 = vmatprep.subr.bf16.mxu0 %v1277_v7  ;;  %1144 = vmatprep.subr.bf16.mxu1 %v1279_v8  ;;  %v245_v7 = vld [vmem:[%s1470_s19 + $0x238] sm:$0xff]  ;;  %v1348_v8 = vcombine.low %v248_v60, %v252_v61  ;;  %v1341_v10 = vcombine.high %v240_v4, %v244_v5  ;;  %v1340_v13 = vcombine.low %v240_v4, %v244_v5 }
  0x6d   : > { %v1343_v11 = vcombine.high %v241_v6, %v245_v7 }
  0x6f   : > { %1094 = vmatpush1.bf16.msra.mxu0 %v1276_v14  ;;  %1145 = vmatpush1.bf16.msra.mxu1 %v1278_v15  ;;  %v1342_v14 = vcombine.low %v241_v6, %v245_v7 }
  0x70   : > { %1095 = vmatprep.subr.bf16.mxu0 %v1397_v16  ;;  %1146 = vmatprep.subr.bf16.mxu1 %v1399_v17 }
  0x73   : > { %1096 = vmatpush2.bf16.msra.mxu0 %v1396_v22  ;;  %1147 = vmatpush2.bf16.msra.mxu1 %v1398_v23 }
  0x74   : > { %1097 = vmatprep.subr.bf16.mxu0 %v1389_v24  ;;  %1148 = vmatprep.subr.bf16.mxu1 %v1391_v26 }
  0x77   : > { %1098 = vmatpush2.bf16.msra.mxu0 %v1388_v31  ;;  %1149 = vmatpush2.bf16.msra.mxu1 %v1390_v32 }
  0x78   : > { %1099 = vmatprep.subr.bf16.mxu0 %v1381_v33  ;;  %1150 = vmatprep.subr.bf16.mxu1 %v1383_v34 }
  0x7b   : > { %1100 = vmatpush2.bf16.msra.mxu0 %v1380_v40  ;;  %1151 = vmatpush2.bf16.msra.mxu1 %v1382_v41 }
  0x7c   : > { %1101 = vmatprep.subr.bf16.mxu0 %v1373_v42  ;;  %1152 = vmatprep.subr.bf16.mxu1 %v1375_v43 }
  0x7f   : > { %1102 = vmatpush2.bf16.msra.mxu0 %v1372_v48  ;;  %1153 = vmatpush2.bf16.msra.mxu1 %v1374_v49 }
  0x80   : > { %1103 = vmatprep.subr.bf16.mxu0 %v1365_v50  ;;  %1154 = vmatprep.subr.bf16.mxu1 %v1367_v51 }
  0x83   : > { %1104 = vmatpush2.bf16.msra.mxu0 %v1364_v56  ;;  %1155 = vmatpush2.bf16.msra.mxu1 %v1366_v57 }
  0x84   : > { %1105 = vmatprep.subr.bf16.mxu0 %v1357_v58  ;;  %1156 = vmatprep.subr.bf16.mxu1 %v1359_v59 }
  0x87   : > { %1106 = vmatpush2.bf16.msra.mxu0 %v1356_v63  ;;  %1157 = vmatpush2.bf16.msra.mxu1 %v1358_v1 }
  0x88   : > { %1107 = vmatprep.subr.bf16.mxu0 %v1349_v2  ;;  %1158 = vmatprep.subr.bf16.mxu1 %v1351_v3 }
  0x8b   : > { %1108 = vmatpush2.bf16.msra.mxu0 %v1348_v8  ;;  %1159 = vmatpush2.bf16.msra.mxu1 %v1350_v9 }
  0x8c   : > { %1109 = vmatprep.subr.bf16.mxu0 %v1341_v10  ;;  %1160 = vmatprep.subr.bf16.mxu1 %v1343_v11 }
  0x8f   : > { %1110 = vmatpush2.bf16.msra.mxu0 %v1340_v13  ;;  %1161 = vmatpush2.bf16.msra.mxu1 %v1342_v14 }
  0x92   : > { %1112 = vmatmul.mubr.bf16.vlgmr.msra.gmra.mxu0 %v1552_v12  ;;  %1163 = vmatmul.mubr.bf16.vlgmr.msra.gmra.mxu1 %v1552_v12 }
  0x93   : > { %1121 = vmatprep.mubr.bf16.mxu0 %v1563_v25  ;;  %1172 = vmatprep.mubr.bf16.mxu1 %v1563_v25 }
  0x9a   : > { %1122 = vmatmul.mubr.bf16.gmra.mxu0 %v1575_v36  ;;  %1173 = vmatmul.mubr.bf16.gmra.mxu1 %v1575_v36 }
  0x9c   : > { %v318_v28 = vpop.permute.xlu1 %317 }
  0xa4   : > { %v308_v15 = vpop.permute.xlu0 %307 }
  0xa8   : > { %v313_v19 = vpop.permute.xlu0 %312 }
 0x112   : > { %v1011_v12 = vpop.f32.mrf.mxu0  ;;  %v1062_v17 = vpop.f32.mrf.mxu1 }
 0x113   : > { %v1012_v16 = vadd.f32 %v1011_v12, %v308_v15  ;;  %v1063_v18 = vadd.f32 %v1062_v17, %v308_v15 }
 0x114   : > { %v1013_v25 = vpop.f32.mrf.mxu0  ;;  %v1064_v20 = vpop.f32.mrf.mxu1 }
 0x115   : > { %1181 = vst [vmem:[%s1639_s6] sm:$0xff] %v1012_v16  ;;  %v1014_v36 = vadd.f32 %v1013_v25, %v308_v15  ;;  %1183 = vst [vmem:[%s1639_s6 + $0x10] sm:$0xff] %v1063_v18  ;;  %v1065_v21 = vadd.f32 %v1064_v20, %v308_v15 }
 0x116   : > { %v1015_v22 = vpop.f32.mrf.mxu0  ;;  %v1066_v24 = vpop.f32.mrf.mxu1 }
 0x117   : > { %1182 = vst [vmem:[%s1639_s6 + $0x8] sm:$0xff] %v1014_v36  ;;  %v1016_v23 = vadd.f32 %v1015_v22, %v313_v19  ;;  %1184 = vst [vmem:[%s1639_s6 + $0x18] sm:$0xff] %v1065_v21  ;;  %v1067_v26 = vadd.f32 %v1066_v24, %v313_v19 }
 0x118   : > { %v1017_v27 = vpop.f32.mrf.mxu0  ;;  %v1068_v30 = vpop.f32.mrf.mxu1 }
 0x119   : > { %1189 = vst [vmem:[%s1639_s6 + $0x40] sm:$0xff] %v1016_v23  ;;  %v1018_v29 = vadd.f32 %v1017_v27, %v313_v19  ;;  %1191 = vst [vmem:[%s1639_s6 + $0x50] sm:$0xff] %v1067_v26  ;;  %v1069_v31 = vadd.f32 %v1068_v30, %v313_v19 }
 0x11a   : > { %v1021_v32 = vpop.f32.mrf.mxu0  ;;  %v1072_v33 = vpop.f32.mrf.mxu1 }
 0x11b   : > { %1190 = vst [vmem:[%s1639_s6 + $0x48] sm:$0xff] %v1018_v29  ;;  %v1022_v34 = vadd.f32 %v1021_v32, %v318_v28  ;;  %1192 = vst [vmem:[%s1639_s6 + $0x58] sm:$0xff] %v1069_v31  ;;  %v1073_v37 = vadd.f32 %v1072_v33, %v318_v28 }
 0x11c   : > { %v1023_v35 = vpop.f32.mrf.mxu0  ;;  %v1074_v38 = vpop.f32.mrf.mxu1 }
 0x11d   : > { %v1024_v39 = vadd.f32 %v1023_v35, %v318_v28  ;;  %1197 = vst [vmem:[%s1639_s6 + $0x80] sm:$0xff] %v1022_v34  ;;  %v1075_v41 = vadd.f32 %v1074_v38, %v318_v28  ;;  %1199 = vst [vmem:[%s1639_s6 + $0x90] sm:$0xff] %v1073_v37 }
 0x11e   : > { %v1025_v40 = vpop.f32.mrf.mxu0  ;;  %v1076_v42 = vpop.f32.mrf.mxu1 }
 0x11f   : > { %1198 = vst [vmem:[%s1639_s6 + $0x88] sm:$0xff] %v1024_v39  ;;  %1200 = vst [vmem:[%s1639_s6 + $0x98] sm:$0xff] %v1075_v41 }
 0x120   : > { %v1026_v43 = vpop.f32.mrf.mxu0  ;;  %v1077_v44 = vpop.f32.mrf.mxu1 }
 0x152   : > { %v1113_v45 = vpop.f32.mrf.mxu0  ;;  %v1164_v47 = vpop.f32.mrf.mxu1 }
 0x153   : > { %v1114_v46 = vadd.f32 %v1113_v45, %v308_v15  ;;  %v1165_v48 = vadd.f32 %v1164_v47, %v308_v15 }
 0x154   : > { %v1115_v49 = vpop.f32.mrf.mxu0  ;;  %v1166_v51 = vpop.f32.mrf.mxu1 }
 0x155   : > { %1185 = vst [vmem:[%s1639_s6 + $0x20] sm:$0xff] %v1114_v46  ;;  %v1116_v50 = vadd.f32 %v1115_v49, %v308_v15  ;;  %1187 = vst [vmem:[%s1639_s6 + $0x30] sm:$0xff] %v1165_v48  ;;  %v1167_v52 = vadd.f32 %v1166_v51, %v308_v15 }
 0x156   : > { %v1117_v53 = vpop.f32.mrf.mxu0  ;;  %v1168_v55 = vpop.f32.mrf.mxu1 }
 0x157   : > { %1186 = vst [vmem:[%s1639_s6 + $0x28] sm:$0xff] %v1116_v50  ;;  %v1118_v54 = vadd.f32 %v1117_v53, %v313_v19  ;;  %1188 = vst [vmem:[%s1639_s6 + $0x38] sm:$0xff] %v1167_v52  ;;  %v1169_v56 = vadd.f32 %v1168_v55, %v313_v19 }
 0x158   : > { %v1119_v57 = vpop.f32.mrf.mxu0  ;;  %v1170_v59 = vpop.f32.mrf.mxu1 }
 0x159   : > { %1193 = vst [vmem:[%s1639_s6 + $0x60] sm:$0xff] %v1118_v54  ;;  %v1120_v58 = vadd.f32 %v1119_v57, %v313_v19  ;;  %1195 = vst [vmem:[%s1639_s6 + $0x70] sm:$0xff] %v1169_v56  ;;  %v1171_v60 = vadd.f32 %v1170_v59, %v313_v19 }
 0x15a   : > { %v1123_v61 = vpop.f32.mrf.mxu0  ;;  %v1174_v62 = vpop.f32.mrf.mxu1 }
 0x15b   : > { %1194 = vst [vmem:[%s1639_s6 + $0x68] sm:$0xff] %v1120_v58  ;;  %v1124_v0 = vadd.f32 %v1123_v61, %v318_v28  ;;  %1196 = vst [vmem:[%s1639_s6 + $0x78] sm:$0xff] %v1171_v60  ;;  %v1175_v63 = vadd.f32 %v1174_v62, %v318_v28 }
 0x15c   : > { %v1125_v1 = vpop.f32.mrf.mxu0  ;;  %v1176_v3 = vpop.f32.mrf.mxu1 }
 0x15d   : > { %1201 = vst [vmem:[%s1639_s6 + $0xa0] sm:$0xff] %v1124_v0  ;;  %v1126_v2 = vadd.f32 %v1125_v1, %v318_v28  ;;  %1203 = vst [vmem:[%s1639_s6 + $0xb0] sm:$0xff] %v1175_v63  ;;  %v1177_v4 = vadd.f32 %v1176_v3, %v318_v28 }
 0x15e   : > { %v1127_v5 = vpop.f32.mrf.mxu0  ;;  %v1178_v6 = vpop.f32.mrf.mxu1 }
 0x15f   : > { %1202 = vst [vmem:[%s1639_s6 + $0xa8] sm:$0xff] %v1126_v2  ;;  %1204 = vst [vmem:[%s1639_s6 + $0xb8] sm:$0xff] %v1177_v4 }
 0x160   : > { %v1128_v7 = vpop.f32.mrf.mxu0  ;;  %v1179_v8 = vpop.f32.mrf.mxu1 }
 0x161 PF: > { %s13_s12 = sadd.s32 1, %s1426_s12  }
 0x162   : > { %p10_p4 = scmp.ge.s32.totalorder %s13_s12, 4  }
 0x164   :  { %12 = sbr.rel (!%p10_p4) target bundleno = 1 (0x1), region = 62 }

// kernel: merged_forward.5
= control target key start
LH: loop header
LB: loop body
LE: loop exit
PB: predicated region body
PF: predicated region fallthrough
CT: control target
= control target key end

     0   :  { %s1001_s12 = smov 0   ;;  %s1190_s0 = inlined_call_operand.vmem [shape: bf16[10,128], index: 0, kind: input, shape index: {}]   ;;  %s1191_s1 = inlined_call_operand.vmem [shape: bf16[2,128,1024], index: 1, kind: input, shape index: {}]   ;;  %s1192_s2 = inlined_call_operand.vmem [shape: f32[10,1], index: 2, kind: input, shape index: {}]   ;;  %s1193_s3 = inlined_call_operand.vmem [shape: f32[2,10,1024], index: 3, kind: output, shape index: {}]  }
   0x1 LB: > { %s883_s13 = sadd.s32 4294967295, %s978_s12   ;;  %p887_p0 = scmp.ge.s32.totalorder %s978_s12, 1  ;;  %s978_s12 = sphi %s1001_s12, %s13_s12  }
   0x2   : > { %p137_p1 = scmp.lt.s32.totalorder %s978_s12, 3 }
   0x4   : > { %p138_p2 = pnand %p887_p0, %p137_p1 }
   0x5   : > { %p161_p3 = scmp.lt.s32.totalorder (!%p138_p2), %s883_s13, 1 }
   0x6   : > { %141 = sbr.rel (%p138_p2) target bundleno = 287 (0x11f), region = 32 }
   0xb   : > { %v980_v0 = vmov 0   ;;  %v302_v1 = vld [vmem:[%s1192_s2] sm:$0xff]  ;;  %s1195_s13 = smov (!%p161_p3, %s883_s13), 1  ;;  %v303_v2 = vld [vmem:[%s1192_s2 + $0x8] sm:$0x3] }
   0xc   : > { %672 = vmatprep.mubr.bf16.mxu0 %v980_v0  ;;  %715 = vmatprep.mubr.bf16.mxu1 %v980_v0  ;;  %s959_s16 = sshll.u32 %s1195_s13, 9  ;;  %s960_s24 = sshll.u32 %s1195_s13, 7 }
   0xd   : > { %970 = vset.pattern.permute.xlu0 %v980_v0  ;;  %s1024_s21 = scalar_lea.vmem %s1191_s1, %s959_s16  ;;  %s1169_s27 = scalar_lea.vmem %s1193_s3, %s960_s24 }
   0xe   : > { %306 = vperm.xlu0 %970, %v302_v1   ;;  %v230_v3 = vld [vmem:[%s1024_s21 + $0x1c0] sm:$0xff]  ;;  %v231_v5 = vld [vmem:[%s1024_s21 + $0x1c8] sm:$0xff] }
   0xf   : > { %v234_v4 = vld [vmem:[%s1024_s21 + $0x1e0] sm:$0xff]  ;;  %v294_v6 = vmax.bf16 %v980_v0, %v230_v3  ;;  %v235_v8 = vld [vmem:[%s1024_s21 + $0x1e8] sm:$0xff]  ;;  %v295_v9 = vmax.bf16 %v980_v0, %v231_v5 }
  0x10   : > { %v298_v7 = vmax.bf16 %v980_v0, %v234_v4  ;;  %v222_v10 = vld [vmem:[%s1024_s21 + $0x180] sm:$0xff]  ;;  %v299_v12 = vmax.bf16 %v980_v0, %v235_v8  ;;  %v223_v15 = vld [vmem:[%s1024_s21 + $0x188] sm:$0xff] }
  0x11   : > { %v226_v11 = vld [vmem:[%s1024_s21 + $0x1a0] sm:$0xff]  ;;  %v286_v13 = vmax.bf16 %v980_v0, %v222_v10  ;;  %v227_v16 = vld [vmem:[%s1024_s21 + $0x1a8] sm:$0xff]  ;;  %v287_v20 = vmax.bf16 %v980_v0, %v223_v15 }
  0x12   : > { %311 = vperm.xlu0 %970, %v303_v2   ;;  %v290_v14 = vmax.bf16 %v980_v0, %v226_v11  ;;  %v214_v17 = vld [vmem:[%s1024_s21 + $0x140] sm:$0xff]  ;;  %v950_v18 = vcombine.high %v294_v6, %v298_v7  ;;  %v949_v19 = vcombine.low %v294_v6, %v298_v7  ;;  %v291_v21 = vmax.bf16 %v980_v0, %v227_v16  ;;  %v215_v23 = vld [vmem:[%s1024_s21 + $0x148] sm:$0xff] }
  0x13   : > { %v218_v22 = vld [vmem:[%s1024_s21 + $0x160] sm:$0xff]  ;;  %v219_v24 = vld [vmem:[%s1024_s21 + $0x168] sm:$0xff]  ;;  %v952_v25 = vcombine.high %v295_v9, %v299_v12  ;;  %v951_v26 = vcombine.low %v295_v9, %v299_v12  ;;  %v278_v32 = vmax.bf16 %v980_v0, %v214_v17  ;;  %v279_v37 = vmax.bf16 %v980_v0, %v215_v23 }
  0x14   : > { %v942_v27 = vcombine.high %v286_v13, %v290_v14  ;;  %v206_v28 = vld [vmem:[%s1024_s21 + $0x100] sm:$0xff]  ;;  %640 = vmatprep.subr.bf16.mxu0 %v950_v18  ;;  %v944_v30 = vcombine.high %v287_v20, %v291_v21  ;;  %v941_v31 = vcombine.low %v286_v13, %v290_v14  ;;  %v282_v33 = vmax.bf16 %v980_v0, %v218_v22  ;;  %v207_v34 = vld [vmem:[%s1024_s21 + $0x108] sm:$0xff] }
  0x15   : > { %v210_v29 = vld [vmem:[%s1024_s21 + $0x120] sm:$0xff]  ;;  %v211_v35 = vld [vmem:[%s1024_s21 + $0x128] sm:$0xff]  ;;  %683 = vmatprep.subr.bf16.mxu1 %v952_v25  ;;  %641 = vmatpush1.bf16.msra.mxu0 %v949_v19  ;;  %v943_v36 = vcombine.low %v287_v20, %v291_v21  ;;  %v283_v38 = vmax.bf16 %v980_v0, %v219_v24  ;;  %v270_v40 = vmax.bf16 %v980_v0, %v206_v28 }
  0x16   : > { %684 = vmatpush1.bf16.msra.mxu1 %v951_v26  ;;  %642 = vmatprep.subr.bf16.mxu0 %v942_v27  ;;  %v934_v39 = vcombine.high %v278_v32, %v282_v33  ;;  %v274_v41 = vmax.bf16 %v980_v0, %v210_v29  ;;  %v271_v43 = vmax.bf16 %v980_v0, %v207_v34  ;;  %v198_v45 = vld [vmem:[%s1024_s21 + $0xc0] sm:$0xff]  ;;  %v199_v47 = vld [vmem:[%s1024_s21 + $0xc8] sm:$0xff] }
  0x17   : > { %685 = vmatprep.subr.bf16.mxu1 %v944_v30  ;;  %v936_v42 = vcombine.high %v279_v37, %v283_v38  ;;  %v275_v44 = vmax.bf16 %v980_v0, %v211_v35  ;;  %v202_v46 = vld [vmem:[%s1024_s21 + $0xe0] sm:$0xff]  ;;  %v203_v48 = vld [vmem:[%s1024_s21 + $0xe8] sm:$0xff]  ;;  %v933_v49 = vcombine.low %v278_v32, %v282_v33  ;;  %v935_v50 = vcombine.low %v279_v37, %v283_v38  ;;  %v232_v30 = vld [vmem:[%s1024_s21 + $0x1d0] sm:$0xff] }
  0x18   : > { %v926_v51 = vcombine.high %v270_v40, %v274_v41  ;;  %v262_v52 = vmax.bf16 %v980_v0, %v198_v45  ;;  %v266_v53 = vmax.bf16 %v980_v0, %v202_v46  ;;  %v263_v55 = vmax.bf16 %v980_v0, %v199_v47  ;;  %v190_v57 = vld [vmem:[%s1024_s21 + $0x80] sm:$0xff]  ;;  %v191_v59 = vld [vmem:[%s1024_s21 + $0x88] sm:$0xff]  ;;  %v233_v32 = vld [vmem:[%s1024_s21 + $0x1d8] sm:$0xff] }
  0x19   : > { %643 = vmatpush1.bf16.msra.mxu0 %v941_v31  ;;  %v928_v54 = vcombine.high %v271_v43, %v275_v44  ;;  %v267_v56 = vmax.bf16 %v980_v0, %v203_v48  ;;  %v194_v58 = vld [vmem:[%s1024_s21 + $0xa0] sm:$0xff]  ;;  %v195_v60 = vld [vmem:[%s1024_s21 + $0xa8] sm:$0xff]  ;;  %v925_v61 = vcombine.low %v270_v40, %v274_v41  ;;  %v927_v62 = vcombine.low %v271_v43, %v275_v44  ;;  %v236_v31 = vld [vmem:[%s1024_s21 + $0x1f0] sm:$0xff] }
  0x1a   : > { %686 = vmatpush1.bf16.msra.mxu1 %v943_v36  ;;  %644 = vmatprep.subr.bf16.mxu0 %v934_v39  ;;  %v918_v63 = vcombine.high %v262_v52, %v266_v53  ;;  %v254_v1 = vmax.bf16 %v980_v0, %v190_v57  ;;  %v258_v2 = vmax.bf16 %v980_v0, %v194_v58  ;;  %v182_v6 = vld [vmem:[%s1024_s21 + $0x40] sm:$0xff]  ;;  %v183_v8 = vld [vmem:[%s1024_s21 + $0x48] sm:$0xff]  ;;  %v237_v33 = vld [vmem:[%s1024_s21 + $0x1f8] sm:$0xff] }
  0x1b   : > { %687 = vmatprep.subr.bf16.mxu1 %v936_v42  ;;  %v920_v3 = vcombine.high %v263_v55, %v267_v56  ;;  %v255_v4 = vmax.bf16 %v980_v0, %v191_v59  ;;  %v259_v5 = vmax.bf16 %v980_v0, %v195_v60  ;;  %v186_v7 = vld [vmem:[%s1024_s21 + $0x60] sm:$0xff]  ;;  %v187_v9 = vld [vmem:[%s1024_s21 + $0x68] sm:$0xff]  ;;  %v917_v10 = vcombine.low %v262_v52, %v266_v53  ;;  %v224_v42 = vld [vmem:[%s1024_s21 + $0x190] sm:$0xff] }
  0x1c   : > { %v919_v11 = vcombine.low %v263_v55, %v267_v56  ;;  %v910_v12 = vcombine.high %v254_v1, %v258_v2  ;;  %v246_v13 = vmax.bf16 %v980_v0, %v182_v6  ;;  %v250_v14 = vmax.bf16 %v980_v0, %v186_v7  ;;  %v174_v15 = vld [vmem:[%s1024_s21] sm:$0xff]  ;;  %v175_v20 = vld [vmem:[%s1024_s21 + $0x8] sm:$0xff]  ;;  %v228_v43 = vld [vmem:[%s1024_s21 + $0x1b0] sm:$0xff] }
  0x1d   : > { %645 = vmatpush1.bf16.msra.mxu0 %v933_v49  ;;  %v912_v16 = vcombine.high %v255_v4, %v259_v5  ;;  %v247_v17 = vmax.bf16 %v980_v0, %v183_v8  ;;  %v251_v18 = vmax.bf16 %v980_v0, %v187_v9  ;;  %v178_v19 = vld [vmem:[%s1024_s21 + $0x20] sm:$0xff]  ;;  %v179_v21 = vld [vmem:[%s1024_s21 + $0x28] sm:$0xff]  ;;  %v909_v22 = vcombine.low %v254_v1, %v258_v2  ;;  %v225_v44 = vld [vmem:[%s1024_s21 + $0x198] sm:$0xff] }
  0x1e   : > { %688 = vmatpush1.bf16.msra.mxu1 %v935_v50  ;;  %646 = vmatprep.subr.bf16.mxu0 %v926_v51  ;;  %v238_v23 = vmax.bf16 %v980_v0, %v174_v15  ;;  %v911_v24 = vcombine.low %v255_v4, %v259_v5  ;;  %v902_v25 = vcombine.high %v246_v13, %v250_v14  ;;  %v229_v45 = vld [vmem:[%s1024_s21 + $0x1b8] sm:$0xff]  ;;  %v220_v55 = vld [vmem:[%s1024_s21 + $0x170] sm:$0xff]  ;;  %v1111_v56 = vld [vmem:[%s1190_s0] sm:$0x1f]  }
  0x1f   : > { %689 = vmatprep.subr.bf16.mxu1 %v928_v54  ;;  %v242_v26 = vmax.bf16 %v980_v0, %v178_v19  ;;  %v904_v27 = vcombine.high %v247_v17, %v251_v18  ;;  %v239_v28 = vmax.bf16 %v980_v0, %v175_v20  ;;  %v243_v29 = vmax.bf16 %v980_v0, %v179_v21  ;;  %v216_v54 = vld [vmem:[%s1024_s21 + $0x150] sm:$0xff]  ;;  %v217_v57 = vld [vmem:[%s1024_s21 + $0x158] sm:$0xff] }
  0x20   : > { %v901_v34 = vcombine.low %v246_v13, %v250_v14  ;;  %v903_v35 = vcombine.low %v247_v17, %v251_v18  ;;  %v296_v37 = vmax.bf16 %v980_v0, %v232_v30  ;;  %v300_v38 = vmax.bf16 %v980_v0, %v236_v31  ;;  %v221_v58 = vld [vmem:[%s1024_s21 + $0x178] sm:$0xff]  ;;  %v208_v1 = vld [vmem:[%s1024_s21 + $0x110] sm:$0xff] }
  0x21   : > { %647 = vmatpush1.bf16.msra.mxu0 %v925_v61  ;;  %v894_v36 = vcombine.high %v238_v23, %v242_v26  ;;  %v896_v39 = vcombine.high %v239_v28, %v243_v29  ;;  %v297_v40 = vmax.bf16 %v980_v0, %v233_v32  ;;  %v301_v41 = vmax.bf16 %v980_v0, %v237_v33  ;;  %v212_v5 = vld [vmem:[%s1024_s21 + $0x130] sm:$0xff]  ;;  %v209_v6 = vld [vmem:[%s1024_s21 + $0x118] sm:$0xff] }
  0x22   : > { %690 = vmatpush1.bf16.msra.mxu1 %v927_v62  ;;  %648 = vmatprep.subr.bf16.mxu0 %v918_v63  ;;  %v893_v46 = vcombine.low %v238_v23, %v242_v26  ;;  %v895_v47 = vcombine.low %v239_v28, %v243_v29  ;;  %v954_v48 = vcombine.high %v296_v37, %v300_v38  ;;  %v213_v7 = vld [vmem:[%s1024_s21 + $0x138] sm:$0xff]  ;;  %v204_v17 = vld [vmem:[%s1024_s21 + $0xf0] sm:$0xff] }
  0x23   : > { %691 = vmatprep.subr.bf16.mxu1 %v920_v3  ;;  %v288_v49 = vmax.bf16 %v980_v0, %v224_v42  ;;  %v292_v50 = vmax.bf16 %v980_v0, %v228_v43  ;;  %v956_v51 = vcombine.high %v297_v40, %v301_v41  ;;  %v289_v52 = vmax.bf16 %v980_v0, %v225_v44  ;;  %v201_v18 = vld [vmem:[%s1024_s21 + $0xd8] sm:$0xff]  ;;  %v192_v28 = vld [vmem:[%s1024_s21 + $0x90] sm:$0xff] }
  0x24   : > { %v293_v53 = vmax.bf16 %v980_v0, %v229_v45  ;;  %v953_v59 = vcombine.low %v296_v37, %v300_v38  ;;  %v955_v60 = vcombine.low %v297_v40, %v301_v41  ;;  %v280_v62 = vmax.bf16 %v980_v0, %v216_v54  ;;  %v205_v19 = vld [vmem:[%s1024_s21 + $0xf8] sm:$0xff]  ;;  %v196_v29 = vld [vmem:[%s1024_s21 + $0xb0] sm:$0xff] }
  0x25   : > { %649 = vmatpush1.bf16.msra.mxu0 %v917_v10  ;;  %v946_v61 = vcombine.high %v288_v49, %v292_v50  ;;  %v284_v63 = vmax.bf16 %v980_v0, %v220_v55  ;;  %v281_v3 = vmax.bf16 %v980_v0, %v217_v57  ;;  %v285_v4 = vmax.bf16 %v980_v0, %v221_v58  ;;  %v193_v30 = vld [vmem:[%s1024_s21 + $0x98] sm:$0xff]  ;;  %v184_v40 = vld [vmem:[%s1024_s21 + $0x50] sm:$0xff] }
  0x26   : > { %692 = vmatpush1.bf16.msra.mxu1 %v919_v11  ;;  %650 = vmatprep.subr.bf16.mxu0 %v910_v12  ;;  %v948_v2 = vcombine.high %v289_v52, %v293_v53  ;;  %v945_v8 = vcombine.low %v288_v49, %v292_v50  ;;  %v272_v9 = vmax.bf16 %v980_v0, %v208_v1  ;;  %v197_v31 = vld [vmem:[%s1024_s21 + $0xb8] sm:$0xff]  ;;  %v188_v41 = vld [vmem:[%s1024_s21 + $0x70] sm:$0xff] }
  0x27   : > { %693 = vmatprep.subr.bf16.mxu1 %v912_v16  ;;  %v947_v10 = vcombine.low %v289_v52, %v293_v53  ;;  %v938_v11 = vcombine.high %v280_v62, %v284_v63  ;;  %v276_v12 = vmax.bf16 %v980_v0, %v212_v5  ;;  %v940_v13 = vcombine.high %v281_v3, %v285_v4  ;;  %v200_v16 = vld [vmem:[%s1024_s21 + $0xd0] sm:$0xff]  ;;  %v185_v42 = vld [vmem:[%s1024_s21 + $0x58] sm:$0xff] }
  0x28   : > { %v273_v14 = vmax.bf16 %v980_v0, %v209_v6  ;;  %v277_v15 = vmax.bf16 %v980_v0, %v213_v7  ;;  %v937_v20 = vcombine.low %v280_v62, %v284_v63  ;;  %v939_v21 = vcombine.low %v281_v3, %v285_v4  ;;  %v189_v43 = vld [vmem:[%s1024_s21 + $0x78] sm:$0xff]  ;;  %v176_v52 = vld [vmem:[%s1024_s21 + $0x10] sm:$0xff] }
  0x29   : > { %651 = vmatpush1.bf16.msra.mxu0 %v909_v22  ;;  %v930_v22 = vcombine.high %v272_v9, %v276_v12  ;;  %v264_v23 = vmax.bf16 %v980_v0, %v200_v16  ;;  %v265_v26 = vmax.bf16 %v980_v0, %v201_v18  ;;  %v929_v32 = vcombine.low %v272_v9, %v276_v12  ;;  %v180_v53 = vld [vmem:[%s1024_s21 + $0x30] sm:$0xff]  ;;  %v177_v54 = vld [vmem:[%s1024_s21 + $0x18] sm:$0xff] }
  0x2a   : > { %694 = vmatpush1.bf16.msra.mxu1 %v911_v24  ;;  %652 = vmatprep.subr.bf16.mxu0 %v902_v25  ;;  %v268_v24 = vmax.bf16 %v980_v0, %v204_v17  ;;  %v932_v25 = vcombine.high %v273_v14, %v277_v15  ;;  %v931_v33 = vcombine.low %v273_v14, %v277_v15  ;;  %v181_v55 = vld [vmem:[%s1024_s21 + $0x38] sm:$0xff] }
  0x2b   : > { %695 = vmatprep.subr.bf16.mxu1 %v904_v27  ;;  %v269_v27 = vmax.bf16 %v980_v0, %v205_v19  ;;  %v257_v38 = vmax.bf16 %v980_v0, %v193_v30  ;;  %v249_v50 = vmax.bf16 %v980_v0, %v185_v42  ;;  %v241_v63 = vmax.bf16 %v980_v0, %v177_v54 }
  0x2c   : > { %v921_v44 = vcombine.low %v264_v23, %v268_v24  ;;  %v245_v1 = vmax.bf16 %v980_v0, %v181_v55 }
  0x2d   : > { %653 = vmatpush1.bf16.msra.mxu0 %v901_v34  ;;  %v922_v34 = vcombine.high %v264_v23, %v268_v24  ;;  %v924_v37 = vcombine.high %v265_v26, %v269_v27  ;;  %v923_v45 = vcombine.low %v265_v26, %v269_v27 }
  0x2e   : > { %696 = vmatpush1.bf16.msra.mxu1 %v903_v35  ;;  %654 = vmatprep.subr.bf16.mxu0 %v894_v36  ;;  %v256_v35 = vmax.bf16 %v980_v0, %v192_v28  ;;  %v260_v36 = vmax.bf16 %v980_v0, %v196_v29  ;;  %v900_v5 = vcombine.high %v241_v63, %v245_v1 }
  0x2f   : > { %697 = vmatprep.subr.bf16.mxu1 %v896_v39  ;;  %v261_v39 = vmax.bf16 %v980_v0, %v197_v31  ;;  %v899_v7 = vcombine.low %v241_v63, %v245_v1 }
  0x30   : > { %v913_v57 = vcombine.low %v256_v35, %v260_v36 }
  0x31   : > { %655 = vmatpush1.bf16.msra.mxu0 %v893_v46  ;;  %v914_v46 = vcombine.high %v256_v35, %v260_v36  ;;  %v916_v49 = vcombine.high %v257_v38, %v261_v39  ;;  %v915_v58 = vcombine.low %v257_v38, %v261_v39 }
  0x32   : > { %698 = vmatpush1.bf16.msra.mxu1 %v895_v47  ;;  %726 = vmatprep.subr.bf16.mxu0 %v954_v48  ;;  %v248_v47 = vmax.bf16 %v980_v0, %v184_v40  ;;  %v252_v48 = vmax.bf16 %v980_v0, %v188_v41 }
  0x33   : > { %769 = vmatprep.subr.bf16.mxu1 %v956_v51  ;;  %v253_v51 = vmax.bf16 %v980_v0, %v189_v43 }
  0x34   : > { %673 = vmatmul.mubr.bf16.vlgmr.msra.gmra.mxu0 %v1111_v56 }
  0x35   : > { %716 = vmatmul.mubr.bf16.vlgmr.msra.gmra.mxu1 %v1111_v56  ;;  %727 = vmatpush1.bf16.msra.mxu0 %v953_v59  ;;  %v906_v59 = vcombine.high %v248_v47, %v252_v48  ;;  %v908_v62 = vcombine.high %v249_v50, %v253_v51  ;;  %v907_v3 = vcombine.low %v249_v50, %v253_v51 }
  0x36   : > { %770 = vmatpush1.bf16.msra.mxu1 %v955_v60  ;;  %728 = vmatprep.subr.bf16.mxu0 %v946_v61  ;;  %v240_v60 = vmax.bf16 %v980_v0, %v176_v52  ;;  %v244_v61 = vmax.bf16 %v980_v0, %v180_v53 }
  0x37   : > { %771 = vmatprep.subr.bf16.mxu1 %v948_v2  ;;  %758 = vmatprep.mubr.bf16.mxu0 %v980_v0  ;;  %v905_v2 = vcombine.low %v248_v47, %v252_v48 }
  0x38   : > { %801 = vmatprep.mubr.bf16.mxu1 %v980_v0  ;;  %v898_v4 = vcombine.high %v240_v60, %v244_v61  ;;  %v897_v6 = vcombine.low %v240_v60, %v244_v61 }
  0x39   : > { %729 = vmatpush1.bf16.msra.mxu0 %v945_v8 }
  0x3a   : > { %772 = vmatpush1.bf16.msra.mxu1 %v947_v10  ;;  %730 = vmatprep.subr.bf16.mxu0 %v938_v11 }
  0x3b   : > { %773 = vmatprep.subr.bf16.mxu1 %v940_v13 }
  0x3d   : > { %731 = vmatpush1.bf16.msra.mxu0 %v937_v20 }
  0x3e   : > { %774 = vmatpush1.bf16.msra.mxu1 %v939_v21  ;;  %732 = vmatprep.subr.bf16.mxu0 %v930_v22 }
  0x3f   : > { %775 = vmatprep.subr.bf16.mxu1 %v932_v25 }
  0x41   : > { %733 = vmatpush1.bf16.msra.mxu0 %v929_v32 }
  0x42   : > { %776 = vmatpush1.bf16.msra.mxu1 %v931_v33  ;;  %734 = vmatprep.subr.bf16.mxu0 %v922_v34 }
  0x43   : > { %777 = vmatprep.subr.bf16.mxu1 %v924_v37 }
  0x45   : > { %735 = vmatpush1.bf16.msra.mxu0 %v921_v44 }
  0x46   : > { %778 = vmatpush1.bf16.msra.mxu1 %v923_v45  ;;  %736 = vmatprep.subr.bf16.mxu0 %v914_v46 }
  0x47   : > { %779 = vmatprep.subr.bf16.mxu1 %v916_v49 }
  0x49   : > { %737 = vmatpush1.bf16.msra.mxu0 %v913_v57 }
  0x4a   : > { %780 = vmatpush1.bf16.msra.mxu1 %v915_v58  ;;  %738 = vmatprep.subr.bf16.mxu0 %v906_v59 }
  0x4b   : > { %781 = vmatprep.subr.bf16.mxu1 %v908_v62 }
  0x4d   : > { %739 = vmatpush1.bf16.msra.mxu0 %v905_v2 }
  0x4e   : > { %782 = vmatpush1.bf16.msra.mxu1 %v907_v3  ;;  %740 = vmatprep.subr.bf16.mxu0 %v898_v4 }
  0x4f   : > { %783 = vmatprep.subr.bf16.mxu1 %v900_v5 }
  0x51   : > { %741 = vmatpush1.bf16.msra.mxu0 %v897_v6 }
  0x52   : > { %784 = vmatpush1.bf16.msra.mxu1 %v899_v7 }
  0x54   : > { %759 = vmatmul.mubr.bf16.vlgmr.msra.gmra.mxu0 %v1111_v56 }
  0x55   : > { %802 = vmatmul.mubr.bf16.vlgmr.msra.gmra.mxu1 %v1111_v56 }
  0x89   : > { %v307_v0 = vpop.permute.xlu0 %306 }
  0x8d   : > { %v312_v13 = vpop.permute.xlu0 %311 }
  0xf4   : > { %v674_v8 = vpop.f32.mrf.mxu0 }
  0xf5   : > { %v675_v9 = vadd.f32 %v674_v8, %v307_v0  ;;  %v717_v10 = vpop.f32.mrf.mxu1 }
  0xf6   : > { %v718_v11 = vadd.f32 %v717_v10, %v307_v0  ;;  %v676_v12 = vpop.f32.mrf.mxu0 }
  0xf7   : > { %812 = vst [vmem:[%s1169_s27] sm:$0xff] %v675_v9  ;;  %v677_v56 = vadd.f32 %v676_v12, %v307_v0  ;;  %v719_v14 = vpop.f32.mrf.mxu1 }
  0xf8   : > { %814 = vst [vmem:[%s1169_s27 + $0x10] sm:$0xff] %v718_v11  ;;  %v720_v15 = vadd.f32 %v719_v14, %v307_v0  ;;  %v678_v16 = vpop.f32.mrf.mxu0 }
  0xf9   : > { %813 = vst [vmem:[%s1169_s27 + $0x8] sm:$0xff] %v677_v56  ;;  %v679_v17 = vadd.f32 %v678_v16, %v312_v13  ;;  %v721_v18 = vpop.f32.mrf.mxu1 }
  0xfa   : > { %815 = vst [vmem:[%s1169_s27 + $0x18] sm:$0xff] %v720_v15  ;;  %v722_v19 = vadd.f32 %v721_v18, %v312_v13  ;;  %v680_v20 = vpop.f32.mrf.mxu0 }
  0xfb   : > { %820 = vst [vmem:[%s1169_s27 + $0x40] sm:$0x3] %v679_v17  ;;  %v681_v21 = vadd.f32 %v680_v20, %v312_v13  ;;  %v723_v22 = vpop.f32.mrf.mxu1 }
  0xfc   : > { %822 = vst [vmem:[%s1169_s27 + $0x50] sm:$0x3] %v722_v19  ;;  %v724_v23 = vadd.f32 %v723_v22, %v312_v13 }
  0xfd   : > { %821 = vst [vmem:[%s1169_s27 + $0x48] sm:$0x3] %v681_v21 }
  0xfe   : > { %823 = vst [vmem:[%s1169_s27 + $0x58] sm:$0x3] %v724_v23 }
 0x114   : > { %v760_v24 = vpop.f32.mrf.mxu0 }
 0x115   : > { %v761_v25 = vadd.f32 %v760_v24, %v307_v0  ;;  %v803_v26 = vpop.f32.mrf.mxu1 }
 0x116   : > { %v804_v27 = vadd.f32 %v803_v26, %v307_v0  ;;  %v762_v28 = vpop.f32.mrf.mxu0 }
 0x117   : > { %816 = vst [vmem:[%s1169_s27 + $0x20] sm:$0xff] %v761_v25  ;;  %v763_v29 = vadd.f32 %v762_v28, %v307_v0  ;;  %v805_v30 = vpop.f32.mrf.mxu1 }
 0x118   : > { %818 = vst [vmem:[%s1169_s27 + $0x30] sm:$0xff] %v804_v27  ;;  %v806_v31 = vadd.f32 %v805_v30, %v307_v0  ;;  %v764_v32 = vpop.f32.mrf.mxu0 }
 0x119   : > { %817 = vst [vmem:[%s1169_s27 + $0x28] sm:$0xff] %v763_v29  ;;  %v765_v33 = vadd.f32 %v764_v32, %v312_v13  ;;  %v807_v34 = vpop.f32.mrf.mxu1 }
 0x11a   : > { %819 = vst [vmem:[%s1169_s27 + $0x38] sm:$0xff] %v806_v31  ;;  %v808_v35 = vadd.f32 %v807_v34, %v312_v13  ;;  %v766_v36 = vpop.f32.mrf.mxu0 }
 0x11b   : > { %824 = vst [vmem:[%s1169_s27 + $0x60] sm:$0x3] %v765_v33  ;;  %v767_v37 = vadd.f32 %v766_v36, %v312_v13  ;;  %v809_v38 = vpop.f32.mrf.mxu1 }
 0x11c   : > { %826 = vst [vmem:[%s1169_s27 + $0x70] sm:$0x3] %v808_v35  ;;  %v810_v39 = vadd.f32 %v809_v38, %v312_v13 }
 0x11d   : > { %825 = vst [vmem:[%s1169_s27 + $0x68] sm:$0x3] %v767_v37 }
 0x11e   : > { %827 = vst [vmem:[%s1169_s27 + $0x78] sm:$0x3] %v810_v39 }
 0x11f PF: > { %s13_s12 = sadd.s32 1, %s978_s12  }
 0x120   : > { %p10_p4 = scmp.ge.s32.totalorder %s13_s12, 4  }
 0x122   :  { %12 = sbr.rel (!%p10_p4) target bundleno = 1 (0x1), region = 62 }

</bundles_post_ra>
